<compile_context>
chip_gen: v5e
topology: v5e:2x2
jax: 0.10.0
libtpu: 0.0.40
codegen_flags: <defaults>
</compile_context>

<pallas_src>
import jax
import jax.numpy as jnp
from jax import lax
from jax.lax import linalg as lax_linalg
from jax.scipy.linalg import solve_triangular
from jax.experimental import pallas as pl
from jax.experimental.pallas import tpu as pltpu


def _rbf_gram_tile_kernel(params_ref, x1_ref, x2_ref, sq1_ref, sq2_ref, k_ref):
    """One (t, t) tile of  var * exp(-0.5*||xi-xj||^2/ls^2)  (+ noise_var on diag)."""
    i = pl.program_id(0)
    j = pl.program_id(1)

    scale = params_ref[0]      # -0.5 / lengthscale^2
    log_var = params_ref[1]    # log(variance)
    noise_var = params_ref[2]  # noisestd^2

    @pl.when(j <= i)           # lower triangle + diagonal: real compute
    def _():
        x1 = x1_ref[...]                                     # (t, D)
        x2 = x2_ref[...]                                     # (t, D)
        cross = lax.dot_general(                             # (t, t) on MXU
            x1, x2,
            dimension_numbers=(((1,), (1,)), ((), ())),
            preferred_element_type=jnp.float32,
        )
        # ||xi - xj||^2 = ||xi||^2 + ||xj||^2 - 2 xi.xj  (norms precomputed)
        d2 = sq1_ref[...] + sq2_ref[...] - 2.0 * cross
        d2 = jnp.maximum(d2, 0.0)
        k_ref[...] = jnp.exp(d2 * scale + log_var)           # single EUP op / elt

    @pl.when(j == i)           # diagonal tile only: add noise jitter in place
    def _():
        tm, tn = k_ref.shape
        r = lax.broadcasted_iota(jnp.int32, (tm, tn), 0)
        c = lax.broadcasted_iota(jnp.int32, (tm, tn), 1)
        k_ref[...] += jnp.where(r == c, noise_var, jnp.float32(0.0))

    @pl.when(j > i)            # strictly-upper tile: never read by the Cholesky
    def _():
        k_ref[...] = jnp.zeros_like(k_ref)


def rbf_gram_plus_jitter(x, lengthscale, variance, noise_var, *, tile=256):
    """Lower triangle (+ diagonal) of K(X,X) + noise_var*I; upper triangle zeroed."""
    x = x.astype(jnp.float32)
    n, d = x.shape

    if n <= tile:
        t = n                                  # single full-extent tile
        n_pad = n
    else:
        assert tile % 128 == 0, "tile must be a multiple of 128 (lane width)"
        t = tile
        n_pad = -(-n // t) * t                 # round N up to a tile multiple
        if n_pad != n:
            x = jnp.pad(x, ((0, n_pad - n), (0, 0)))

    g = n_pad // t

    ls = jnp.asarray(lengthscale, jnp.float32)
    var = jnp.asarray(variance, jnp.float32)
    params = jnp.stack(
        [-0.5 / (ls * ls), jnp.log(var), jnp.asarray(noise_var, jnp.float32)]
    ).astype(jnp.float32)

    sq = jnp.sum(x * x, axis=1, keepdims=True)               # (n_pad, 1)
    sq_row = sq
    sq_col = sq.reshape(1, n_pad)                            # (1, n_pad)

    lower_tiles = g * (g + 1) // 2
    cost = pl.CostEstimate(
        flops=int(lower_tiles * (2 * t * t * d + 6 * t * t)),
        transcendentals=int(lower_tiles * t * t),
        bytes_accessed=int(4 * (n_pad * n_pad + 2 * n_pad * d + 2 * n_pad)),
    )

    out = pl.pallas_call(
        _rbf_gram_tile_kernel,
        out_shape=jax.ShapeDtypeStruct((n_pad, n_pad), jnp.float32),
        grid=(g, g),
        in_specs=[
            pl.BlockSpec(memory_space=pltpu.MemorySpace.SMEM),   # params (scalars)
            pl.BlockSpec((t, d), lambda i, j: (i, 0)),           # row block of X
            pl.BlockSpec((t, d), lambda i, j: (j, 0)),           # col block of X
            pl.BlockSpec((t, 1), lambda i, j: (i, 0)),           # row sq-norms
            pl.BlockSpec((1, t), lambda i, j: (0, j)),           # col sq-norms
        ],
        out_specs=pl.BlockSpec((t, t), lambda i, j: (i, j)),
        compiler_params=pltpu.CompilerParams(
            dimension_semantics=("parallel", "parallel"),
            vmem_limit_bytes=32 * 1024 * 1024,
        ),
        cost_estimate=cost,
    )(params, x, x, sq_row, sq_col)

    if n_pad != n:
        out = out[:n, :n]
    return out


class GPRCholeskyJax:
    """JAX / Pallas port of pytorchgp GPRCholesky (forward pass)."""

    def __init__(self, key):
        k_noise, _, _ = jax.random.split(key, 3)
        # noisestd = exp(uniform(0, 1))  -- matches the PyTorch __init__.
        self.noisestd = jnp.exp(
            jax.random.uniform(k_noise, (1,), minval=0.0, maxval=1.0)
        ).astype(jnp.float32)
        # Deterministic RBF (squared-exponential) hyper-parameters; the PyTorch
        # module takes `kernel` as a constructor argument.
        self.lengthscale = jnp.float32(1.0)
        self.variance = jnp.float32(1.0)

    def forward(self, X, y, *, tile=256):
        """Returns (posterior mean-weights alpha, Cholesky factor L)."""
        noise_var = (self.noisestd[0] ** 2).astype(jnp.float32)

        # Hot path in Pallas: lower triangle of Gram matrix + diagonal jitter.
        kxx_j = rbf_gram_plus_jitter(
            X, self.lengthscale, self.variance, noise_var, tile=tile
        )

        # TODO(synk): Cholesky factorization / triangular solves are inherently
        # sequential; kept in plain JAX linalg (no clean Pallas equivalent).
        # symmetrize_input=False -> only the lower triangle (the part the
        # Pallas kernel actually computed) is read.
        L = lax_linalg.cholesky(kxx_j, symmetrize_input=False)
        y32 = y.astype(jnp.float32)
        a = solve_triangular(L, y32, lower=True)                 # L a = y
        alpha = solve_triangular(L, a, lower=True, trans="T")    # L^T alpha = a
        m = alpha                                                # == squeeze(0)
        S = L
        return m, S


if __name__ == "__main__":
    key = jax.random.PRNGKey(0)
    k_model, k_x, k_y = jax.random.split(key, 3)

    # Small GP problem: 300 points, 8 features.  With tile=256 this exercises a
    # 2x2 grid (padding to 512), the diagonal / lower / skipped-upper tile
    # paths, and the padded-row slicing.
    N, D = 300, 8
    X = jax.random.normal(k_x, (N, D), dtype=jnp.float32)
    y = jax.random.normal(k_y, (N, 1), dtype=jnp.float32)

    model = GPRCholeskyJax(k_model)
    m, S = model.forward(X, y)
    m = jax.block_until_ready(m)
    S = jax.block_until_ready(S)

    # ---- pure-JAX reference of the same math -----------------------------
    nv = model.noisestd[0] ** 2
    d2_ref = jnp.sum((X[:, None, :] - X[None, :, :]) ** 2, axis=-1)
    K_ref = model.variance * jnp.exp(
        -0.5 * d2_ref / (model.lengthscale * model.lengthscale)
    ) + nv * jnp.eye(N, dtype=jnp.float32)
    L_ref = jnp.linalg.cholesky(K_ref)
    alpha_ref = jnp.linalg.solve(L_ref.T, jnp.linalg.solve(L_ref, y))

    # Pallas Gram kernel: its lower triangle must match the reference Gram.
    K_pallas = rbf_gram_plus_jitter(
        X, model.lengthscale, model.variance, nv.astype(jnp.float32)
    )
    assert bool(
        jnp.allclose(jnp.tril(K_pallas), jnp.tril(K_ref), atol=1e-4, rtol=1e-4)
    )

    assert m.shape == (N, 1) and S.shape == (N, N)
    assert bool(jnp.all(jnp.isfinite(m))) and bool(jnp.all(jnp.isfinite(S)))
    assert bool(jnp.allclose(m, alpha_ref, atol=5e-3, rtol=5e-3))
    assert bool(jnp.allclose(S, L_ref, atol=2e-3, rtol=2e-3))

    print("KERNEL_OK")
</pallas_src>

<mosaic_0001>
module attributes {stable_mosaic.version = 11 : i64} {
  func.func @_rbf_gram_tile_kernel(%arg0: i32, %arg1: i32, %arg2: memref<3xf32, #tpu.memory_space<smem>>, %arg3: memref<256x8xf32, #tpu.memory_space<vmem>>, %arg4: memref<256x8xf32, #tpu.memory_space<vmem>>, %arg5: memref<256x1xf32, #tpu.memory_space<vmem>>, %arg6: memref<1x256xf32, #tpu.memory_space<vmem>>, %arg7: memref<256x256xf32, #tpu.memory_space<vmem>>) attributes {dimension_semantics = [#tpu.dimension_semantics<parallel>, #tpu.dimension_semantics<parallel>], iteration_bounds = array<i64: 2, 2>, scalar_prefetch = 0 : i64, scratch_operands = 0 : i64, tpu.core_type = #tpu.core_type<tc>, window_params = [{transform_indices = @transform_0, window_bounds = array<i64: 3>}, {transform_indices = @transform_1, window_bounds = array<i64: 256, 8>}, {transform_indices = @transform_2, window_bounds = array<i64: 256, 8>}, {transform_indices = @transform_3, window_bounds = array<i64: 256, 1>}, {transform_indices = @transform_4, window_bounds = array<i64: 1, 256>}, {transform_indices = @transform_5, window_bounds = array<i64: 256, 256>}]} {
    %c0 = arith.constant 0 : index
    %0 = memref.load %arg2[%c0] : memref<3xf32, #tpu.memory_space<smem>>
    %c1 = arith.constant 1 : index
    %1 = memref.load %arg2[%c1] : memref<3xf32, #tpu.memory_space<smem>>
    %c2 = arith.constant 2 : index
    %2 = memref.load %arg2[%c2] : memref<3xf32, #tpu.memory_space<smem>>
    %3 = arith.cmpi sle, %arg1, %arg0 : i32
    %4 = arith.extui %3 : i1 to i32
    %c0_i32 = arith.constant 0 : i32
    %5 = arith.cmpi ne, %4, %c0_i32 : i32
    scf.if %5 {
      %c0_2 = arith.constant 0 : index
      %c0_3 = arith.constant 0 : index
      %12 = vector.load %arg3[%c0_2, %c0_3] : memref<256x8xf32, #tpu.memory_space<vmem>>, vector<256x8xf32>
      %c0_4 = arith.constant 0 : index
      %c0_5 = arith.constant 0 : index
      %13 = vector.load %arg4[%c0_4, %c0_5] : memref<256x8xf32, #tpu.memory_space<vmem>>, vector<256x8xf32>
      %cst = arith.constant dense<0.000000e+00> : vector<256x256xf32>
      %14 = tpu.matmul %12, %13, %cst {dimension_numbers = #tpu.dot_dimension_numbers<[1], [1], [0], [0], [0, 0, 1, 0], [], []>} : vector<256x8xf32>, vector<256x8xf32>, vector<256x256xf32> -> vector<256x256xf32>
      %c0_6 = arith.constant 0 : index
      %c0_7 = arith.constant 0 : index
      %15 = vector.load %arg5[%c0_6, %c0_7] : memref<256x1xf32, #tpu.memory_space<vmem>>, vector<256x1xf32>
      %c0_8 = arith.constant 0 : index
      %c0_9 = arith.constant 0 : index
      %16 = vector.load %arg6[%c0_8, %c0_9] : memref<1x256xf32, #tpu.memory_space<vmem>>, vector<1x256xf32>
      %17 = vector.broadcast %15 : vector<256x1xf32> to vector<256x256xf32>
      %18 = vector.broadcast %16 : vector<1x256xf32> to vector<256x256xf32>
      %19 = arith.addf %17, %18 : vector<256x256xf32>
      %cst_10 = arith.constant 2.000000e+00 : f32
      %20 = vector.broadcast %cst_10 : f32 to vector<256x256xf32>
      %21 = arith.mulf %20, %14 : vector<256x256xf32>
      %22 = arith.subf %19, %21 : vector<256x256xf32>
      %cst_11 = arith.constant 0.000000e+00 : f32
      %23 = vector.broadcast %cst_11 : f32 to vector<256x256xf32>
      %24 = arith.maximumf %22, %23 : vector<256x256xf32>
      %25 = vector.broadcast %0 : f32 to vector<256x256xf32>
      %26 = arith.mulf %24, %25 : vector<256x256xf32>
      %27 = vector.broadcast %1 : f32 to vector<256x256xf32>
      %28 = arith.addf %26, %27 : vector<256x256xf32>
      %29 = math.exp %28 : vector<256x256xf32>
      %c0_12 = arith.constant 0 : index
      %c0_13 = arith.constant 0 : index
      %30 = vector.load %arg7[%c0_12, %c0_13] : memref<256x256xf32, #tpu.memory_space<vmem>>, vector<256x256xf32>
      tpu.vector_store %arg7[%c0_12, %c0_13], %29 {strides = array<i32>} : memref<256x256xf32, #tpu.memory_space<vmem>>, vector<256x256xf32>,
    } else {
    }
    %6 = arith.cmpi eq, %arg1, %arg0 : i32
    %7 = arith.extui %6 : i1 to i32
    %c0_i32_0 = arith.constant 0 : i32
    %8 = arith.cmpi ne, %7, %c0_i32_0 : i32
    scf.if %8 {
      %12 = tpu.iota {dimensions = array<i32: 0>} : vector<256x256xi32>
      %13 = tpu.iota {dimensions = array<i32: 1>} : vector<256x256xi32>
      %c0_2 = arith.constant 0 : index
      %c0_3 = arith.constant 0 : index
      %14 = vector.load %arg7[%c0_2, %c0_3] : memref<256x256xf32, #tpu.memory_space<vmem>>, vector<256x256xf32>
      %15 = arith.cmpi eq, %12, %13 : vector<256x256xi32>
      %cst = arith.constant 0.000000e+00 : f32
      %16 = vector.broadcast %2 : f32 to vector<256x256xf32>
      %17 = vector.broadcast %cst : f32 to vector<256x256xf32>
      %18 = arith.select %15, %16, %17 : vector<256x256xi1>, vector<256x256xf32>
      %19 = arith.addf %14, %18 : vector<256x256xf32>
      %c0_4 = arith.constant 0 : index
      %c0_5 = arith.constant 0 : index
      %20 = vector.load %arg7[%c0_4, %c0_5] : memref<256x256xf32, #tpu.memory_space<vmem>>, vector<256x256xf32>
      tpu.vector_store %arg7[%c0_4, %c0_5], %19 {strides = array<i32>} : memref<256x256xf32, #tpu.memory_space<vmem>>, vector<256x256xf32>,
    } else {
    }
    %9 = arith.cmpi sgt, %arg1, %arg0 : i32
    %10 = arith.extui %9 : i1 to i32
    %c0_i32_1 = arith.constant 0 : i32
    %11 = arith.cmpi ne, %10, %c0_i32_1 : i32
    scf.if %11 {
      %cst = arith.constant 0.000000e+00 : f32
      %12 = vector.broadcast %cst : f32 to vector<256x256xf32>
      %c0_2 = arith.constant 0 : index
      %c0_3 = arith.constant 0 : index
      %13 = vector.load %arg7[%c0_2, %c0_3] : memref<256x256xf32, #tpu.memory_space<vmem>>, vector<256x256xf32>
      tpu.vector_store %arg7[%c0_2, %c0_3], %12 {strides = array<i32>} : memref<256x256xf32, #tpu.memory_space<vmem>>, vector<256x256xf32>,
    } else {
    }
    return
  }
  func.func @transform_0(%arg0: i32, %arg1: i32) -> i32 {
    %c0_i32 = arith.constant 0 : i32
    %c0_i32_0 = arith.constant 0 : i32
    return %c0_i32 : i32
  }
  func.func @transform_1(%arg0: i32, %arg1: i32) -> (i32, i32) {
    %c0_i32 = arith.constant 0 : i32
    %c0_i32_0 = arith.constant 0 : i32
    return %arg0, %c0_i32 : i32, i32
  }
  func.func @transform_2(%arg0: i32, %arg1: i32) -> (i32, i32) {
    %c0_i32 = arith.constant 0 : i32
    %c0_i32_0 = arith.constant 0 : i32
    return %arg1, %c0_i32 : i32, i32
  }
  func.func @transform_3(%arg0: i32, %arg1: i32) -> (i32, i32) {
    %c0_i32 = arith.constant 0 : i32
    %c0_i32_0 = arith.constant 0 : i32
    return %arg0, %c0_i32 : i32, i32
  }
  func.func @transform_4(%arg0: i32, %arg1: i32) -> (i32, i32) {
    %c0_i32 = arith.constant 0 : i32
    %c0_i32_0 = arith.constant 0 : i32
    return %c0_i32, %arg1 : i32, i32
  }
  func.func @transform_5(%arg0: i32, %arg1: i32) -> (i32, i32) {
    %c0_i32 = arith.constant 0 : i32
    return %arg0, %arg1 : i32, i32
  }
}

</mosaic_0001>

<bundles_post_ra>
// kernel: tpu_custom_call.1
= control target key start
LH: loop header
LB: loop body
LE: loop exit
PB: predicated region body
PF: predicated region fallthrough
CT: control target
= control target key end

     0   :  { %s3692_s0 = inlined_call_operand.vmem [shape: f32[3], index: 0, kind: input, shape index: {}]   ;;  %s3693_s1 = inlined_call_operand.vmem [shape: f32[512,8], index: 1, kind: input, shape index: {}]   ;;  %s3694_s2 = inlined_call_operand.vmem [shape: f32[512,8], index: 2, kind: input, shape index: {}]   ;;  %s3695_s3 = inlined_call_operand.vmem [shape: f32[512,1], index: 3, kind: input, shape index: {}]   ;;  %s3696_s4 = inlined_call_operand.vmem [shape: f32[1,512], index: 4, kind: input, shape index: {}]   ;;  %s3697_s5 = inlined_call_operand.hbm [shape: f32[512,512], index: 5, kind: output, shape index: {}]  }
   0x1   :  { %3703 = sst [smem:[#allocation12_spill]] %s3692_s0 }
   0x2   :  { %3704 = sst [smem:[#allocation13_spill]] %s3693_s1 }
   0x3   :  { %10 = vsyncpa [#allocation4], 0 }
   0x4   :  { %11 = vsyncpa [#allocation3], 0 }
   0x5   :  { %13 = vsyncpa [#allocation3 + $0x1], 0  ;;  %s2678_s18 = smov 0   ;;  %s2680_s19 = smov 0  }
   0x6   :  { %s2682_s20 = smov 0   ;;  %s2684_s21 = smov 0  }
   0x7   :  { %s2686_s22 = smov 0   ;;  %s2688_s23 = smov 0  }
   0x8   :  { %s2690_s24 = smov 0   ;;  %s2692_s25 = smov 0  }
   0x9 LB: > { %3705 = sst [smem:[#allocation8_spill]] %s2632_s23  ;;  %s2153_s26 = sadd.s32 4294967295, %s2640_s25   ;;  %s2640_s25 = sphi %s2692_s25, %s19_s25   ;;  %s2636_s24 = sphi %s2690_s24, %s3717_s24   ;;  %s2632_s23 = sphi %s2688_s23, %s3716_s23   ;;  %s2628_s22 = sphi %s2686_s22, %s3715_s22   ;;  %s2624_s21 = sphi %s2684_s21, %s3714_s21   ;;  %s2620_s20 = sphi %s2682_s20, %s3720_s20   ;;  %s2616_s19 = sphi %s2680_s19, %s3719_s19   ;;  %s2612_s18 = sphi %s2678_s18, %s3718_s18  }
   0xa   : > { %3706 = sst [smem:[#allocation9_spill]] %s2636_s24  ;;  %s2154_s27 = sadd.s32 4294967294, %s2640_s25  }
   0xb   : > { %s28_s28 = sadd.s32 1, %s2632_s23  ;;  %s31_s29 = sadd.s32 1, %s2636_s24 }
   0xc   : > { %p29_p0 = scmp.ge.s32.totalorder %s28_s28, 2  ;;  %s165_s30 = sadd.s32 1, %s2620_s20 }
   0xd   : > { %p175_p1 = scmp.ne.s32.totalorder %s2620_s20, %s2616_s19  ;;  %p176_p2 = scmp.eq.s32.totalorder %s2153_s26, 3 }
   0xe   : > { %s3722_s28 = smov (%p29_p0, %s28_s28), 0  ;;  %s3724_s29 = smov (!%p29_p0, %s31_s29), %s2636_s24 }
   0xf   : > { %3707 = sst [smem:[#allocation10_spill]] %s3722_s28  ;;  %s161_s6 = ssub.s32 %s2632_s23, %s3722_s28 }
  0x10   : > { %p2730_p3 = por %p176_p2, %p175_p1  ;;  %p33_p4 = scmp.ge.s32.totalorder %s3724_s29, 2 }
  0x11   : > { %p181_p5 = scmp.ne.s32.totalorder %s2616_s19, %s2612_s18  ;;  %p182_p6 = scmp.eq.s32.totalorder %s2154_s27, 3 }
  0x12   : > { %p2155_p7 = scmp.ge.s32.totalorder %s2640_s25, 1  ;;  %s3726_s29 = smov (%p33_p4, %s3724_s29), 0 }
  0x13   : > { %3709 = sst [smem:[#allocation11_spill]] %s3726_s29  ;;  %p2739_p8 = por %p182_p6, %p181_p5 }
  0x14   : > { %p189_p9 = scmp.lt.s32.totalorder %s2640_s25, 5  ;;  %s160_s9 = ssub.s32 %s2636_s24, %s3726_s29 }
  0x15   : > { %s162_s10 = sor.u32 %s161_s6, %s160_s9  ;;  %p2323_p12 = scmp.eq.s32.totalorder %s2153_s26, 0 }
  0x16   : > { %p190_p10 = pnand %p2155_p7, %p189_p9  ;;  %p163_p11 = scmp.eq.s32.totalorder %s162_s10, 0 }
  0x17   : > { %s3711_s0 = sld [smem:[#allocation12_spill]]  ;;  %s2642_s15 = smov [#allocation2]  }
  0x18   : > { %p2315_p13 = pneg %p190_p10 }
  0x19   : > { %s2750_s14 = scalar_select %p163_p11, %s2620_s20, %s165_s30  }
  0x1a   : > { %p2316_p0 = pnand %p2323_p12, %p2315_p13  ;;  %249 = sbr.rel (%p190_p10) target bundleno = 527 (0x20f), region = 40 }
  0x1d   : > { %s201_s13 = sshll.u32 %s3711_s0, 4  ;;  %s202_s13 = int_to_ptr.vmem [resolvable:$true] %s201_s13 }
  0x1e   : > { %2318 = dma.vmem_to_smem (!%p2316_p0), %s202_s13, 16, %s2642_s15, [#allocation4]  }
  0x1f   : > { %2603 = dma.done.wait (%p2323_p12), [#allocation4], 16  }
  0x20   : > { %2605 = vsyncadd (%p2323_p12), [#allocation4], 4294967280 }
  0x21   : > { %256 = sfence }
  0x22   : > { %s3698_s16 = sand.u32 1, %s2616_s19   ;;  %s2161_s17 = sshll.u32 %s2628_s22, 5 }
  0x23   : > { %s2160_s26 = sshll.u32 %s3698_s16, 9  ;;  %p294_p1 = scmp.lt.s32.totalorder %s2161_s17, 63 }
  0x24   : > { %s2163_s27 = sshll.u32 %s2624_s21, 5  ;;  %s2758_s30 = sshll.u32 %s2624_s21, 1 }
  0x25   : > { %s3728_s17 = smov (!%p294_p1, %s2161_s17), 63  ;;  %p300_p2 = scmp.lt.s32.totalorder %s2163_s27, 63 }
  0x26   : > { %s2162_s6 = sshll.u32 %s3728_s17, 3  ;;  %p312_p4 = scmp.lt.s32.totalorder %s2758_s30, 3 }
  0x27   : > { %s3712_s1 = sld [smem:[#allocation13_spill]]  ;;  %s2769_s15 = scalar_lea.vmem %s3695_s3, %s2162_s6 }
  0x28   : > { %s3730_s27 = smov (!%p300_p2, %s2163_s27), 63  ;;  %s2774_s29 = sld [smem:[#allocation2]] }
  0x29   : > { %s2772_s16 = scalar_select %p312_p4, %s2758_s30, 3 }
  0x2a   : > { %s2164_s0 = sshll.u32 %s3730_s27, 3  ;;  %s2785_s23 = sld [smem:[#allocation2 + $0x1]] }
  0x2b   : > { %s2779_s24 = scalar_lea.vmem %s3694_s2, %s2164_s0  ;;  %s2789_s12 = scalar_lea.vmem [#allocation5], %s2160_s26 }
  0x2c   : > { %p2170_p5 = scmp.gt.s32.totalorder %s2624_s21, %s2628_s22 }
  0x2d   : > { %s2764_s11 = scalar_lea.vmem %s3712_s1, %s2162_s6  ;;  %s314_s1 = scalar_lea.vmem %s3696_s4, %s2772_s16 }
  0x2e   : > { %s2787_s6 = sld [smem:[#allocation2 + $0x2]]  ;;  %324 = sbr.rel (%p2170_p5) target bundleno = 388 (0x184), region = 48 }
  0x33   : > { %v372_v0 = vld [vmem:[%s2779_s24 + $0x78] sm:$0xff]  ;;  %vm389_vm0 = vcmask 64512   ;;  %v371_v2 = vld [vmem:[%s2779_s24 + $0x70] sm:$0xff]  ;;  %v370_v4 = vld [vmem:[%s2779_s24 + $0x68] sm:$0xff]  ;;  %v2643_v7 = vmov 0  }
  0x34   : > { %v388_v1 = vld [vmem:[%s2779_s24 + $0xf8] sm:$0xff]  ;;  %2171 = vmatpush.xpose.msk.msra.mxu0 %vm389_vm0, %v372_v0  ;;  %2277 = vmatpush.xpose.msk.msra.mxu2 %vm389_vm0, %v372_v0  ;;  %v387_v3 = vld [vmem:[%s2779_s24 + $0xf0] sm:$0xff]  ;;  %v386_v6 = vld [vmem:[%s2779_s24 + $0xe8] sm:$0xff] }
  0x35   : > { %2219 = vmatpush.xpose.msk.msra.mxu1 %vm389_vm0, %v388_v1  ;;  %2293 = vmatpush.xpose.msk.msra.mxu3 %vm389_vm0, %v388_v1  ;;  %v810_v5 = vld [vmem:[%s2769_s15 + $0x10] sm:$0xff]  ;;  %v808_v8 = vld [vmem:[%s2769_s15] sm:$0xff]  ;;  %v368_v11 = vld [vmem:[%s2779_s24 + $0x58] sm:$0xff] }
  0x36   : > { %2397 = vset.pattern.permute.xlu1 %v2643_v7  ;;  %2396 = vset.pattern.permute.xlu0 %v2643_v7  ;;  %v369_v9 = vld [vmem:[%s2779_s24 + $0x60] sm:$0xff]  ;;  %v811_v12 = vld [vmem:[%s2769_s15 + $0x18] sm:$0xff]  ;;  %v809_v13 = vld [vmem:[%s2769_s15 + $0x8] sm:$0xff] }
  0x37   : > { %853 = vperm.xlu1 %2397, %v810_v5   ;;  %843 = vperm.xlu0 %2396, %v808_v8   ;;  %v385_v10 = vld [vmem:[%s2779_s24 + $0xe0] sm:$0xff]  ;;  %v384_v14 = vld [vmem:[%s2779_s24 + $0xd8] sm:$0xff]  ;;  %v367_v15 = vld [vmem:[%s2779_s24 + $0x50] sm:$0xff] }
  0x38   : > { %2172 = vmatpush.xpose.msk.msra.mxu0 %vm389_vm0, %v371_v2  ;;  %2278 = vmatpush.xpose.msk.msra.mxu2 %vm389_vm0, %v371_v2  ;;  %v383_v16 = vld [vmem:[%s2779_s24 + $0xd0] sm:$0xff]  ;;  %v366_v17 = vld [vmem:[%s2779_s24 + $0x48] sm:$0xff]  ;;  %v815_v18 = vld [vmem:[%s2769_s15 + $0x38] sm:$0xff] }
  0x39   : > { %2220 = vmatpush.xpose.msk.msra.mxu1 %vm389_vm0, %v387_v3  ;;  %2294 = vmatpush.xpose.msk.msra.mxu3 %vm389_vm0, %v387_v3  ;;  %v814_v19 = vld [vmem:[%s2769_s15 + $0x30] sm:$0xff]  ;;  %v382_v20 = vld [vmem:[%s2779_s24 + $0xc8] sm:$0xff]  ;;  %v365_v21 = vld [vmem:[%s2779_s24 + $0x40] sm:$0xff] }
  0x3a   : > { %2398 = vset.pattern.permute.xlu2 %v2643_v7  ;;  %v381_v22 = vld [vmem:[%s2779_s24 + $0xc0] sm:$0xff]  ;;  %v364_v23 = vld [vmem:[%s2779_s24 + $0x38] sm:$0xff]  ;;  %v818_v25 = vld [vmem:[%s2769_s15 + $0x50] sm:$0xff] }
  0x3b   : > { %v380_v24 = vld [vmem:[%s2779_s24 + $0xb8] sm:$0xff]  ;;  %v817_v26 = vld [vmem:[%s2769_s15 + $0x48] sm:$0xff]  ;;  %v363_v27 = vld [vmem:[%s2779_s24 + $0x30] sm:$0xff] }
  0x3c   : > { %2173 = vmatpush.xpose.msk.msra.mxu0 %vm389_vm0, %v370_v4  ;;  %2279 = vmatpush.xpose.msk.msra.mxu2 %vm389_vm0, %v370_v4  ;;  %v379_v28 = vld [vmem:[%s2779_s24 + $0xb0] sm:$0xff]  ;;  %v362_v29 = vld [vmem:[%s2779_s24 + $0x28] sm:$0xff]  ;;  %v812_v31 = vld [vmem:[%s2769_s15 + $0x20] sm:$0xff] }
  0x3d   : > { %2221 = vmatpush.xpose.msk.msra.mxu1 %vm389_vm0, %v386_v6  ;;  %2295 = vmatpush.xpose.msk.msra.mxu3 %vm389_vm0, %v386_v6  ;;  %v378_v30 = vld [vmem:[%s2779_s24 + $0xa8] sm:$0xff]  ;;  %v820_v33 = vld [vmem:[%s2769_s15 + $0x60] sm:$0xff]  ;;  %v360_v36 = vld [vmem:[%s2779_s24 + $0x18] sm:$0xff] }
  0x3e   : > { %v821_v32 = vld [vmem:[%s2769_s15 + $0x68] sm:$0xff]  ;;  %v361_v34 = vld [vmem:[%s2779_s24 + $0x20] sm:$0xff]  ;;  %863 = vperm.xlu2 %2398, %v812_v31   ;;  %v376_v37 = vld [vmem:[%s2779_s24 + $0x98] sm:$0xff] }
  0x3f   : > { %858 = vperm.xlu1 %2397, %v811_v12   ;;  %848 = vperm.xlu0 %2396, %v809_v13   ;;  %v377_v35 = vld [vmem:[%s2779_s24 + $0xa0] sm:$0xff]  ;;  %v813_v38 = vld [vmem:[%s2769_s15 + $0x28] sm:$0xff]  ;;  %v823_v40 = vld [vmem:[%s2769_s15 + $0x78] sm:$0xff] }
  0x40   : > { %2174 = vmatpush.xpose.msk.msra.mxu0 %vm389_vm0, %v369_v9  ;;  %2280 = vmatpush.xpose.msk.msra.mxu2 %vm389_vm0, %v369_v9  ;;  %v824_v39 = vld [vmem:[%s2769_s15 + $0x80] sm:$0xff]  ;;  %v359_v41 = vld [vmem:[%s2779_s24 + $0x10] sm:$0xff]  ;;  %v358_v43 = vld [vmem:[%s2779_s24 + $0x8] sm:$0xff] }
  0x41   : > { %2222 = vmatpush.xpose.msk.msra.mxu1 %vm389_vm0, %v385_v10  ;;  %2296 = vmatpush.xpose.msk.msra.mxu3 %vm389_vm0, %v385_v10  ;;  %v375_v42 = vld [vmem:[%s2779_s24 + $0x90] sm:$0xff]  ;;  %v374_v44 = vld [vmem:[%s2779_s24 + $0x88] sm:$0xff]  ;;  %v816_v45 = vld [vmem:[%s2769_s15 + $0x40] sm:$0xff] }
  0x42   : > { %v827_v46 = vld [vmem:[%s2769_s15 + $0x98] sm:$0xff]  ;;  %v826_v47 = vld [vmem:[%s2769_s15 + $0x90] sm:$0xff]  ;;  %v357_v48 = vld [vmem:[%s2779_s24] sm:$0xff] }
  0x43   : > { %v373_v49 = vld [vmem:[%s2779_s24 + $0x80] sm:$0xff]  ;;  %v819_v52 = vld [vmem:[%s2769_s15 + $0x58] sm:$0xff]  ;;  %v830_v53 = vld [vmem:[%s2769_s15 + $0xb0] sm:$0xff] }
  0x44   : > { %2175 = vmatpush.xpose.msk.msra.mxu0 %vm389_vm0, %v368_v11  ;;  %2281 = vmatpush.xpose.msk.msra.mxu2 %vm389_vm0, %v368_v11  ;;  %v325_v50 = vld [vmem:[%s2764_s11] sm:$0xff]  ;;  %v829_v54 = vld [vmem:[%s2769_s15 + $0xa8] sm:$0xff]  ;;  %v822_v57 = vld [vmem:[%s2769_s15 + $0x70] sm:$0xff] }
  0x45   : > { %2223 = vmatpush.xpose.msk.msra.mxu1 %vm389_vm0, %v384_v14  ;;  %2297 = vmatpush.xpose.msk.msra.mxu3 %vm389_vm0, %v384_v14  ;;  %v341_v51 = vld [vmem:[%s2764_s11 + $0x80] sm:$0xff]  ;;  %v326_v55 = vld [vmem:[%s2764_s11 + $0x8] sm:$0xff]  ;;  %v327_v60 = vld [vmem:[%s2764_s11 + $0x10] sm:$0xff] }
  0x46   : > { %868 = vperm.xlu2 %2398, %v813_v38   ;;  %v342_v56 = vld [vmem:[%s2764_s11 + $0x88] sm:$0xff]  ;;  %v832_v59 = vld [vmem:[%s2769_s15 + $0xc0] sm:$0xff]  ;;  %v343_v61 = vld [vmem:[%s2764_s11 + $0x90] sm:$0xff] }
  0x47   : > { %878 = vperm.xlu1 %2397, %v815_v18   ;;  %873 = vperm.xlu0 %2396, %v814_v19   ;;  %v833_v58 = vld [vmem:[%s2769_s15 + $0xc8] sm:$0xff]  ;;  %v836_v63 = vld [vmem:[%s2769_s15 + $0xe0] sm:$0xff]  ;;  %v835_v0 = vld [vmem:[%s2769_s15 + $0xd8] sm:$0xff] }
  0x48   : > { %2176 = vmatpush.xpose.msk.msra.mxu0 %vm389_vm0, %v367_v15  ;;  %2282 = vmatpush.xpose.msk.msra.mxu2 %vm389_vm0, %v367_v15  ;;  %v825_v62 = vld [vmem:[%s2769_s15 + $0x88] sm:$0xff]  ;;  %v328_v1 = vld [vmem:[%s2764_s11 + $0x18] sm:$0xff]  ;;  %v838_v4 = vld [vmem:[%s2769_s15 + $0xf0] sm:$0xff] }
  0x49   : > { %2224 = vmatpush.xpose.msk.msra.mxu1 %vm389_vm0, %v383_v16  ;;  %2298 = vmatpush.xpose.msk.msra.mxu3 %vm389_vm0, %v383_v16  ;;  %v344_v2 = vld [vmem:[%s2764_s11 + $0x98] sm:$0xff]  ;;  %v329_v5 = vld [vmem:[%s2764_s11 + $0x20] sm:$0xff]  ;;  %v330_v8 = vld [vmem:[%s2764_s11 + $0x28] sm:$0xff] }
  0x4a   : > { %v839_v3 = vld [vmem:[%s2769_s15 + $0xf8] sm:$0xff]  ;;  %v345_v6 = vld [vmem:[%s2764_s11 + $0xa0] sm:$0xff]  ;;  %v346_v9 = vld [vmem:[%s2764_s11 + $0xa8] sm:$0xff] }
  0x4b   : > { %v828_v7 = vld [vmem:[%s2769_s15 + $0xa0] sm:$0xff]  ;;  %v831_v10 = vld [vmem:[%s2769_s15 + $0xb8] sm:$0xff]  ;;  %v331_v11 = vld [vmem:[%s2764_s11 + $0x30] sm:$0xff] }
  0x4c   : > { %2177 = vmatpush.xpose.msk.msra.mxu0 %vm389_vm0, %v366_v17  ;;  %2283 = vmatpush.xpose.msk.msra.mxu2 %vm389_vm0, %v366_v17  ;;  %v347_v12 = vld [vmem:[%s2764_s11 + $0xb0] sm:$0xff]  ;;  %v332_v14 = vld [vmem:[%s2764_s11 + $0x38] sm:$0xff]  ;;  %v837_v16 = vld [vmem:[%s2769_s15 + $0xe8] sm:$0xff] }
  0x4d   : > { %2225 = vmatpush.xpose.msk.msra.mxu1 %vm389_vm0, %v382_v20  ;;  %2299 = vmatpush.xpose.msk.msra.mxu3 %vm389_vm0, %v382_v20  ;;  %v834_v13 = vld [vmem:[%s2769_s15 + $0xd0] sm:$0xff]  ;;  %v348_v15 = vld [vmem:[%s2764_s11 + $0xb8] sm:$0xff]  ;;  %v333_v17 = vld [vmem:[%s2764_s11 + $0x40] sm:$0xff] }
  0x4e   : > { %883 = vperm.xlu2 %2398, %v816_v45   ;;  %v349_v18 = vld [vmem:[%s2764_s11 + $0xc0] sm:$0xff]  ;;  %v334_v19 = vld [vmem:[%s2764_s11 + $0x48] sm:$0xff]  ;;  %v356_v45 = vld [vmem:[%s2764_s11 + $0xf8] sm:$0xff] }
  0x4f   : > { %893 = vperm.xlu1 %2397, %v818_v25   ;;  %888 = vperm.xlu0 %2396, %v817_v26   ;;  %v350_v20 = vld [vmem:[%s2764_s11 + $0xc8] sm:$0xff]  ;;  %v336_v25 = vld [vmem:[%s2764_s11 + $0x58] sm:$0xff] }
  0x50   : > { %2178 = vmatpush.xpose.msk.msra.mxu0 %vm389_vm0, %v365_v21  ;;  %2284 = vmatpush.xpose.msk.msra.mxu2 %vm389_vm0, %v365_v21  ;;  %v335_v21 = vld [vmem:[%s2764_s11 + $0x50] sm:$0xff]  ;;  %v352_v26 = vld [vmem:[%s2764_s11 + $0xd8] sm:$0xff] }
  0x51   : > { %2226 = vmatpush.xpose.msk.msra.mxu1 %vm389_vm0, %v381_v22  ;;  %2300 = vmatpush.xpose.msk.msra.mxu3 %vm389_vm0, %v381_v22  ;;  %v351_v22 = vld [vmem:[%s2764_s11 + $0xd0] sm:$0xff] }
  0x54   : > { %2179 = vmatpush.xpose.msk.msra.mxu0 %vm389_vm0, %v364_v23  ;;  %2285 = vmatpush.xpose.msk.msra.mxu2 %vm389_vm0, %v364_v23 }
  0x55   : > { %2227 = vmatpush.xpose.msk.msra.mxu1 %vm389_vm0, %v380_v24  ;;  %2301 = vmatpush.xpose.msk.msra.mxu3 %vm389_vm0, %v380_v24 }
  0x56   : > { %898 = vperm.xlu2 %2398, %v819_v52  }
  0x57   : > { %908 = vperm.xlu1 %2397, %v821_v32   ;;  %903 = vperm.xlu0 %2396, %v820_v33  }
  0x58   : > { %2180 = vmatpush.xpose.msk.msra.mxu0 %vm389_vm0, %v363_v27  ;;  %2286 = vmatpush.xpose.msk.msra.mxu2 %vm389_vm0, %v363_v27 }
  0x59   : > { %2228 = vmatpush.xpose.msk.msra.mxu1 %vm389_vm0, %v379_v28  ;;  %2302 = vmatpush.xpose.msk.msra.mxu3 %vm389_vm0, %v379_v28 }
  0x5c   : > { %2181 = vmatpush.xpose.msk.msra.mxu0 %vm389_vm0, %v362_v29  ;;  %2287 = vmatpush.xpose.msk.msra.mxu2 %vm389_vm0, %v362_v29  ;;  %v337_v29 = vld [vmem:[%s2764_s11 + $0x60] sm:$0xff] }
  0x5d   : > { %2229 = vmatpush.xpose.msk.msra.mxu1 %vm389_vm0, %v378_v30  ;;  %2303 = vmatpush.xpose.msk.msra.mxu3 %vm389_vm0, %v378_v30  ;;  %v353_v30 = vld [vmem:[%s2764_s11 + $0xe0] sm:$0xff] }
  0x5e   : > { %913 = vperm.xlu2 %2398, %v822_v57  }
  0x5f   : > { %923 = vperm.xlu1 %2397, %v824_v39   ;;  %918 = vperm.xlu0 %2396, %v823_v40   ;;  %v339_v39 = vld [vmem:[%s2764_s11 + $0x70] sm:$0xff] }
  0x60   : > { %2182 = vmatpush.xpose.msk.msra.mxu0 %vm389_vm0, %v361_v34  ;;  %2288 = vmatpush.xpose.msk.msra.mxu2 %vm389_vm0, %v361_v34  ;;  %v338_v34 = vld [vmem:[%s2764_s11 + $0x68] sm:$0xff]  ;;  %v355_v40 = vld [vmem:[%s2764_s11 + $0xf0] sm:$0xff] }
  0x61   : > { %2230 = vmatpush.xpose.msk.msra.mxu1 %vm389_vm0, %v377_v35  ;;  %2304 = vmatpush.xpose.msk.msra.mxu3 %vm389_vm0, %v377_v35  ;;  %v354_v35 = vld [vmem:[%s2764_s11 + $0xe8] sm:$0xff] }
  0x64   : > { %2183 = vmatpush.xpose.msk.msra.mxu0 %vm389_vm0, %v360_v36  ;;  %2289 = vmatpush.xpose.msk.msra.mxu2 %vm389_vm0, %v360_v36 }
  0x65   : > { %2231 = vmatpush.xpose.msk.msra.mxu1 %vm389_vm0, %v376_v37  ;;  %2305 = vmatpush.xpose.msk.msra.mxu3 %vm389_vm0, %v376_v37 }
  0x66   : > { %928 = vperm.xlu2 %2398, %v825_v62  }
  0x67   : > { %938 = vperm.xlu1 %2397, %v827_v46   ;;  %933 = vperm.xlu0 %2396, %v826_v47  }
  0x68   : > { %2184 = vmatpush.xpose.msk.msra.mxu0 %vm389_vm0, %v359_v41  ;;  %2290 = vmatpush.xpose.msk.msra.mxu2 %vm389_vm0, %v359_v41 }
  0x69   : > { %2232 = vmatpush.xpose.msk.msra.mxu1 %vm389_vm0, %v375_v42  ;;  %2306 = vmatpush.xpose.msk.msra.mxu3 %vm389_vm0, %v375_v42 }
  0x6c   : > { %2185 = vmatpush.xpose.msk.msra.mxu0 %vm389_vm0, %v358_v43  ;;  %2291 = vmatpush.xpose.msk.msra.mxu2 %vm389_vm0, %v358_v43  ;;  %v840_v43 = vld [vmem:[%s314_s1] sm:$0x3] }
  0x6d   : > { %2233 = vmatpush.xpose.msk.msra.mxu1 %vm389_vm0, %v374_v44  ;;  %2307 = vmatpush.xpose.msk.msra.mxu3 %vm389_vm0, %v374_v44  ;;  %v340_v44 = vld [vmem:[%s2764_s11 + $0x78] sm:$0xff]  ;;  %v3040_v47 = vperm.slane %v840_v43, 0 }
  0x6e   : > { %943 = vperm.xlu2 %2398, %v828_v7  }
  0x6f   : > { %953 = vperm.xlu1 %2397, %v830_v53   ;;  %948 = vperm.xlu0 %2396, %v829_v54  }
  0x70   : > { %2186 = vmatpush.xpose.msk.msra.mxu0 %vm389_vm0, %v357_v48  ;;  %2292 = vmatpush.xpose.msk.msra.mxu2 %vm389_vm0, %v357_v48  ;;  %v3044_v48 = vperm.slane %v840_v43, 1 }
  0x71   : > { %2234 = vmatpush.xpose.msk.msra.mxu1 %vm389_vm0, %v373_v49  ;;  %2308 = vmatpush.xpose.msk.msra.mxu3 %vm389_vm0, %v373_v49 }
  0x73   : > { %2187 = vmatmul.msk.f32.vlgmr.msra.gmra.mxu0 %vm389_vm0, %v325_v50  ;;  %2203 = vmatmul.msk.f32.vlgmr.msra.gmra.mxu2 %vm389_vm0, %v341_v51 }
  0x74   : > { %2235 = vmatmul.msk.f32.vlgmr.msra.gmra.mxu1 %vm389_vm0, %v325_v50  ;;  %2251 = vmatmul.msk.f32.vlgmr.msra.gmra.mxu3 %vm389_vm0, %v341_v51 }
  0x76   : > { %958 = vperm.xlu2 %2398, %v831_v10  }
  0x77   : > { %968 = vperm.xlu1 %2397, %v833_v58   ;;  %963 = vperm.xlu0 %2396, %v832_v59   ;;  %v3055_v59 = vstv %s2774_s29 }
  0x7b   : > { %2188 = vmatmul.msk.f32.gmra.mxu0 %vm389_vm0, %v326_v55  ;;  %2204 = vmatmul.msk.f32.gmra.mxu2 %vm389_vm0, %v342_v56 }
  0x7c   : > { %2236 = vmatmul.msk.f32.gmra.mxu1 %vm389_vm0, %v326_v55  ;;  %2252 = vmatmul.msk.f32.gmra.mxu3 %vm389_vm0, %v342_v56 }
  0x7e   : > { %973 = vperm.xlu2 %2398, %v834_v13  }
  0x7f   : > { %983 = vperm.xlu1 %2397, %v836_v63   ;;  %978 = vperm.xlu0 %2396, %v835_v0   ;;  %v3059_v63 = vstv %s2785_s23 }
  0x83   : > { %2189 = vmatmul.msk.f32.gmra.mxu0 %vm389_vm0, %v327_v60  ;;  %2205 = vmatmul.msk.f32.gmra.mxu2 %vm389_vm0, %v343_v61 }
  0x84   : > { %2237 = vmatmul.msk.f32.gmra.mxu1 %vm389_vm0, %v327_v60  ;;  %2253 = vmatmul.msk.f32.gmra.mxu3 %vm389_vm0, %v343_v61 }
  0x86   : > { %988 = vperm.xlu2 %2398, %v837_v16  }
  0x87   : > { %998 = vperm.xlu1 %2397, %v839_v3   ;;  %993 = vperm.xlu0 %2396, %v838_v4  }
  0x8b   : > { %2190 = vmatmul.msk.f32.gmra.mxu0 %vm389_vm0, %v328_v1  ;;  %2206 = vmatmul.msk.f32.gmra.mxu2 %vm389_vm0, %v344_v2 }
  0x8c   : > { %2238 = vmatmul.msk.f32.gmra.mxu1 %vm389_vm0, %v328_v1  ;;  %2254 = vmatmul.msk.f32.gmra.mxu3 %vm389_vm0, %v344_v2 }
  0x93   : > { %2191 = vmatmul.msk.f32.gmra.mxu0 %vm389_vm0, %v329_v5  ;;  %2207 = vmatmul.msk.f32.gmra.mxu2 %vm389_vm0, %v345_v6 }
  0x94   : > { %2239 = vmatmul.msk.f32.gmra.mxu1 %vm389_vm0, %v329_v5  ;;  %2255 = vmatmul.msk.f32.gmra.mxu3 %vm389_vm0, %v345_v6 }
  0x98   : > { %v2991_v27 = vpop.permute.xlu2 %863 }
  0x9b   : > { %2192 = vmatmul.msk.f32.gmra.mxu0 %vm389_vm0, %v330_v8  ;;  %2208 = vmatmul.msk.f32.gmra.mxu2 %vm389_vm0, %v346_v9 }
  0x9c   : > { %2240 = vmatmul.msk.f32.gmra.mxu1 %vm389_vm0, %v330_v8  ;;  %2256 = vmatmul.msk.f32.gmra.mxu3 %vm389_vm0, %v346_v9 }
  0xa0   : > { %v3001_v32 = vpop.permute.xlu2 %868 }
  0xa3   : > { %2193 = vmatmul.msk.f32.gmra.mxu0 %vm389_vm0, %v331_v11  ;;  %2209 = vmatmul.msk.f32.gmra.mxu2 %vm389_vm0, %v347_v12 }
  0xa4   : > { %2241 = vmatmul.msk.f32.gmra.mxu1 %vm389_vm0, %v331_v11  ;;  %2257 = vmatmul.msk.f32.gmra.mxu3 %vm389_vm0, %v347_v12 }
  0xa8   : > { %v3017_v37 = vpop.permute.xlu2 %883 }
  0xa9   : > { %v2983_v23 = vpop.permute.xlu1 %853  ;;  %v844_v24 = vpop.permute.xlu0 %843 }
  0xaa   : > { %v1006_v49 = vadd.f32 %v3040_v47, %v844_v24  ;;  %v1007_v51 = vadd.f32 %v3044_v48, %v844_v24  ;;  %v1010_v43 = vadd.f32 %v3040_v47, %v2983_v23 }
  0xab   : > { %2194 = vmatmul.msk.f32.gmra.mxu0 %vm389_vm0, %v332_v14  ;;  %2210 = vmatmul.msk.f32.gmra.mxu2 %vm389_vm0, %v348_v15 }
  0xac   : > { %2242 = vmatmul.msk.f32.gmra.mxu1 %vm389_vm0, %v332_v14  ;;  %2258 = vmatmul.msk.f32.gmra.mxu3 %vm389_vm0, %v348_v15 }
  0xb0   : > { %v3029_v42 = vpop.permute.xlu2 %898 }
  0xb1   : > { %v2993_v28 = vpop.permute.xlu1 %858  ;;  %v849_v31 = vpop.permute.xlu0 %848 }
  0xb2   : > { %v1008_v3 = vadd.f32 %v3040_v47, %v849_v31  ;;  %v1009_v7 = vadd.f32 %v3044_v48, %v849_v31 }
  0xb3   : > { %2195 = vmatmul.msk.f32.gmra.mxu0 %vm389_vm0, %v333_v17  ;;  %2211 = vmatmul.msk.f32.gmra.mxu2 %vm389_vm0, %v349_v18 }
  0xb4   : > { %2243 = vmatmul.msk.f32.gmra.mxu1 %vm389_vm0, %v333_v17  ;;  %2259 = vmatmul.msk.f32.gmra.mxu3 %vm389_vm0, %v349_v18 }
  0xb8   : > { %v3052_v53 = vpop.permute.xlu2 %913 }
  0xb9   : > { %v3007_v33 = vpop.permute.xlu1 %878  ;;  %v3013_v36 = vpop.permute.xlu0 %873 }
  0xbb   : > { %2196 = vmatmul.msk.f32.gmra.mxu0 %vm389_vm0, %v334_v19  ;;  %2212 = vmatmul.msk.f32.gmra.mxu2 %vm389_vm0, %v350_v20 }
  0xbc   : > { %2244 = vmatmul.msk.f32.gmra.mxu1 %vm389_vm0, %v334_v19  ;;  %2260 = vmatmul.msk.f32.gmra.mxu3 %vm389_vm0, %v350_v20 }
  0xc0   : > { %v929_v19 = vpop.permute.xlu2 %928 }
  0xc1   : > { %v3019_v38 = vpop.permute.xlu1 %893  ;;  %v3027_v41 = vpop.permute.xlu0 %888  ;;  %v1040_v31 = vadd.f32 %v3040_v47, %v929_v19 }
  0xc3   : > { %2197 = vmatmul.msk.f32.gmra.mxu0 %vm389_vm0, %v335_v21  ;;  %2213 = vmatmul.msk.f32.gmra.mxu2 %vm389_vm0, %v351_v22 }
  0xc4   : > { %2245 = vmatmul.msk.f32.gmra.mxu1 %vm389_vm0, %v335_v21  ;;  %2261 = vmatmul.msk.f32.gmra.mxu3 %vm389_vm0, %v351_v22 }
  0xc9   : > { %v3038_v46 = vpop.permute.xlu1 %908  ;;  %v3049_v50 = vpop.permute.xlu0 %903 }
  0xcb   : > { %2198 = vmatmul.msk.f32.gmra.mxu0 %vm389_vm0, %v336_v25  ;;  %2214 = vmatmul.msk.f32.gmra.mxu2 %vm389_vm0, %v352_v26 }
  0xcc   : > { %2246 = vmatmul.msk.f32.gmra.mxu1 %vm389_vm0, %v336_v25  ;;  %2262 = vmatmul.msk.f32.gmra.mxu3 %vm389_vm0, %v352_v26 }
  0xd1   : > { %v924_v57 = vpop.permute.xlu1 %923  ;;  %v3068_v16 = vpop.permute.xlu0 %918 }
  0xd2   : > { %v1038_v62 = vadd.f32 %v3040_v47, %v924_v57  ;;  %v1039_v1 = vadd.f32 %v3044_v48, %v924_v57 }
  0xd3   : > { %2199 = vmatmul.msk.f32.gmra.mxu0 %vm389_vm0, %v337_v29  ;;  %2215 = vmatmul.msk.f32.gmra.mxu2 %vm389_vm0, %v353_v30 }
  0xd4   : > { %2247 = vmatmul.msk.f32.gmra.mxu1 %vm389_vm0, %v337_v29  ;;  %2263 = vmatmul.msk.f32.gmra.mxu3 %vm389_vm0, %v353_v30 }
  0xdb   : > { %2200 = vmatmul.msk.f32.gmra.mxu0 %vm389_vm0, %v338_v34  ;;  %2216 = vmatmul.msk.f32.gmra.mxu2 %vm389_vm0, %v354_v35 }
  0xdc   : > { %2248 = vmatmul.msk.f32.gmra.mxu1 %vm389_vm0, %v338_v34  ;;  %2264 = vmatmul.msk.f32.gmra.mxu3 %vm389_vm0, %v354_v35 }
  0xe3   : > { %2201 = vmatmul.msk.f32.gmra.mxu0 %vm389_vm0, %v339_v39  ;;  %2217 = vmatmul.msk.f32.gmra.mxu2 %vm389_vm0, %v355_v40 }
  0xe4   : > { %2249 = vmatmul.msk.f32.gmra.mxu1 %vm389_vm0, %v339_v39  ;;  %2265 = vmatmul.msk.f32.gmra.mxu3 %vm389_vm0, %v355_v40  ;;  %v1041_v39 = vadd.f32 %v3044_v48, %v929_v19 }
  0xeb   : > { %2202 = vmatmul.msk.f32.gmra.mxu0 %vm389_vm0, %v340_v44  ;;  %2218 = vmatmul.msk.f32.gmra.mxu2 %vm389_vm0, %v356_v45 }
  0xec   : > { %2250 = vmatmul.msk.f32.gmra.mxu1 %vm389_vm0, %v340_v44  ;;  %2266 = vmatmul.msk.f32.gmra.mxu3 %vm389_vm0, %v356_v45 }
  0xf0   : > { %v599_v52 = vpop.f32.mrf.mxu0 }
  0xf1   : > { %v1070_v54 = vmul.f32 2.0, %v599_v52  ;;  %v712_v55 = vpop.f32.mrf.mxu1  ;;  %v1011_v52 = vadd.f32 %v3044_v48, %v2983_v23 }
  0xf2   : > { %v1071_v56 = vmul.f32 2.0, %v712_v55 }
  0xf3   : > { %v1134_v58 = vsub.f32 %v1006_v49, %v1070_v54 }
  0xf4   : > { %v1135_v60 = vsub.f32 %v1007_v51, %v1071_v56 }
  0xf5   : > { %v1198_v61 = vmax.f32 %v1134_v58, 0.0 }
  0xf6   : > { %v1199_v0 = vmax.f32 %v1135_v60, 0.0  ;;  %v647_v2 = vpop.f32.mrf.mxu2 }
  0xf7   : > { %v1263_v4 = vmul.f32 %v3055_v59, %v1198_v61  ;;  %v1102_v5 = vmul.f32 2.0, %v647_v2  ;;  %v760_v6 = vpop.f32.mrf.mxu3 }
  0xf8   : > { %v1264_v8 = vmul.f32 %v3055_v59, %v1199_v0  ;;  %v1103_v9 = vmul.f32 2.0, %v760_v6  ;;  %v602_v10 = vpop.f32.mrf.mxu0 }
  0xf9   : > { %v1328_v11 = vadd.f32 %v3059_v63, %v1263_v4  ;;  %v1166_v12 = vsub.f32 %v1038_v62, %v1102_v5  ;;  %v1072_v13 = vmul.f32 2.0, %v602_v10  ;;  %v715_v14 = vpop.f32.mrf.mxu1  ;;  %v934_v10 = vpop.permute.xlu0 %933 }
  0xfa   : > { %v1329_v15 = vadd.f32 %v3059_v63, %v1264_v8  ;;  %v1167_v17 = vsub.f32 %v1039_v1, %v1103_v9  ;;  %v1073_v18 = vmul.f32 2.0, %v715_v14 }
  0xfb   : > { %v1392_v20 = vmul.f32 1.442695, %v1328_v11  ;;  %v1230_v21 = vmax.f32 %v1166_v12, 0.0  ;;  %v1136_v22 = vsub.f32 %v1008_v3, %v1072_v13  ;;  %v1042_v13 = vadd.f32 %v3040_v47, %v934_v10 }
  0xfc   : > { %v1394_v24 = vmul.f32 1.442695, %v1329_v15  ;;  %v1231_v25 = vmax.f32 %v1167_v17, 0.0  ;;  %v1137_v26 = vsub.f32 %v1009_v7, %v1073_v18  ;;  %v1043_v17 = vadd.f32 %v3044_v48, %v934_v10 }
  0xfd   : > { %2399 = vpow2.f32 %v1392_v20  ;;  %v1295_v29 = vmul.f32 %v3055_v59, %v1230_v21  ;;  %v1200_v30 = vmax.f32 %v1136_v22, 0.0  ;;  %v1012_v21 = vadd.f32 %v3040_v47, %v2993_v28 }
  0xfe   : > { %2401 = vpow2.f32 %v1394_v24  ;;  %v1296_v34 = vmul.f32 %v3055_v59, %v1231_v25  ;;  %v1201_v35 = vmax.f32 %v1137_v26, 0.0  ;;  %v650_v40 = vpop.f32.mrf.mxu2 }
  0xff   : > { %v1360_v44 = vadd.f32 %v3059_v63, %v1295_v29  ;;  %v1265_v45 = vmul.f32 %v3055_v59, %v1200_v30  ;;  %v1104_v49 = vmul.f32 2.0, %v650_v40  ;;  %v763_v51 = vpop.f32.mrf.mxu3  ;;  %v1013_v29 = vadd.f32 %v3044_v48, %v2993_v28 }
 0x100   : > { %v1361_v54 = vadd.f32 %v3059_v63, %v1296_v34  ;;  %v1266_v55 = vmul.f32 %v3055_v59, %v1201_v35  ;;  %v1105_v56 = vmul.f32 2.0, %v763_v51  ;;  %v605_v57 = vpop.f32.mrf.mxu0 }
 0x101   : > { %v1456_v58 = vmul.f32 1.442695, %v1360_v44  ;;  %v1330_v60 = vadd.f32 %v3059_v63, %v1265_v45  ;;  %v1168_v61 = vsub.f32 %v1040_v31, %v1104_v49  ;;  %v1074_v62 = vmul.f32 2.0, %v605_v57  ;;  %v718_v0 = vpop.f32.mrf.mxu1 }
 0x102   : > { %v1458_v1 = vmul.f32 1.442695, %v1361_v54  ;;  %v1331_v2 = vadd.f32 %v3059_v63, %v1266_v55  ;;  %v1169_v3 = vsub.f32 %v1041_v39, %v1105_v56  ;;  %v1075_v4 = vmul.f32 2.0, %v718_v0 }
 0x103   : > { %v2400_v23 = vpop.eup %2399  ;;  %2403 = vpow2.f32 %v1456_v58  ;;  %v1396_v5 = vmul.f32 1.442695, %v1330_v60  ;;  %v1232_v6 = vmax.f32 %v1168_v61, 0.0  ;;  %v1138_v7 = vsub.f32 %v1010_v43, %v1074_v62  ;;  %v939_v62 = vpop.permute.xlu1 %938 }
 0x104   : > { %v2402_v8 = vpop.eup %2401  ;;  %1520 = vst [vmem:[%s2789_s12] sm:$0xff] %v2400_v23  ;;  %2405 = vpow2.f32 %v1458_v1  ;;  %v1398_v9 = vmul.f32 1.442695, %v1331_v2  ;;  %v1233_v11 = vmax.f32 %v1169_v3, 0.0  ;;  %v1139_v12 = vsub.f32 %v1011_v52, %v1075_v4 }
 0x105   : > { %1521 = vst [vmem:[%s2789_s12 + $0x8] sm:$0xff] %v2402_v8  ;;  %2407 = vpow2.f32 %v1396_v5  ;;  %v1297_v14 = vmul.f32 %v3055_v59, %v1232_v6  ;;  %v1202_v15 = vmax.f32 %v1138_v7, 0.0  ;;  %v1044_v3 = vadd.f32 %v3040_v47, %v939_v62 }
 0x106   : > { %2409 = vpow2.f32 %v1398_v9  ;;  %v1298_v18 = vmul.f32 %v3055_v59, %v1233_v11  ;;  %v1203_v19 = vmax.f32 %v1139_v12, 0.0  ;;  %v653_v20 = vpop.f32.mrf.mxu2  ;;  %v1045_v5 = vadd.f32 %v3044_v48, %v939_v62 }
 0x107   : > { %v1362_v22 = vadd.f32 %v3059_v63, %v1297_v14  ;;  %v1267_v24 = vmul.f32 %v3055_v59, %v1202_v15  ;;  %v1106_v25 = vmul.f32 2.0, %v653_v20  ;;  %v766_v26 = vpop.f32.mrf.mxu3  ;;  %v1014_v9 = vadd.f32 %v3040_v47, %v2991_v27 }
 0x108   : > { %v1363_v30 = vadd.f32 %v3059_v63, %v1298_v18  ;;  %v1268_v31 = vmul.f32 %v3055_v59, %v1203_v19  ;;  %v1107_v34 = vmul.f32 2.0, %v766_v26  ;;  %v608_v35 = vpop.f32.mrf.mxu0  ;;  %v1015_v14 = vadd.f32 %v3044_v48, %v2991_v27 }
 0x109   : > { %v2404_v39 = vpop.eup %2403  ;;  %v1460_v40 = vmul.f32 1.442695, %v1362_v22  ;;  %v1332_v43 = vadd.f32 %v3059_v63, %v1267_v24  ;;  %v1170_v44 = vsub.f32 %v1042_v13, %v1106_v25  ;;  %v1076_v45 = vmul.f32 2.0, %v608_v35  ;;  %v721_v49 = vpop.f32.mrf.mxu1 }
 0x10a   : > { %v2406_v51 = vpop.eup %2405  ;;  %1552 = vst [vmem:[%s2789_s12 + $0x100] sm:$0xff] %v2404_v39  ;;  %v1462_v52 = vmul.f32 1.442695, %v1363_v30  ;;  %v1333_v28 = vadd.f32 %v3059_v63, %v1268_v31  ;;  %v1171_v54 = vsub.f32 %v1043_v17, %v1107_v34  ;;  %v1077_v55 = vmul.f32 2.0, %v721_v49  ;;  %v944_v49 = vpop.permute.xlu2 %943 }
 0x10b   : > { %v2408_v56 = vpop.eup %2407  ;;  %1553 = vst [vmem:[%s2789_s12 + $0x108] sm:$0xff] %v2406_v51  ;;  %2411 = vpow2.f32 %v1460_v40  ;;  %v1400_v57 = vmul.f32 1.442695, %v1332_v43  ;;  %v1234_v58 = vmax.f32 %v1170_v44, 0.0  ;;  %v1140_v60 = vsub.f32 %v1012_v21, %v1076_v45 }
 0x10c   : > { %v2410_v61 = vpop.eup %2409  ;;  %1522 = vst [vmem:[%s2789_s12 + $0x10] sm:$0xff] %v2408_v56  ;;  %2413 = vpow2.f32 %v1462_v52  ;;  %v1402_v0 = vmul.f32 1.442695, %v1333_v28  ;;  %v1235_v1 = vmax.f32 %v1171_v54, 0.0  ;;  %v1141_v2 = vsub.f32 %v1013_v29, %v1077_v55 }
 0x10d   : > { %1523 = vst [vmem:[%s2789_s12 + $0x18] sm:$0xff] %v2410_v61  ;;  %2415 = vpow2.f32 %v1400_v57  ;;  %v1299_v4 = vmul.f32 %v3055_v59, %v1234_v58  ;;  %v1204_v23 = vmax.f32 %v1140_v60, 0.0  ;;  %v1046_v28 = vadd.f32 %v3040_v47, %v944_v49 }
 0x10e   : > { %2417 = vpow2.f32 %v1402_v0  ;;  %v1300_v6 = vmul.f32 %v3055_v59, %v1235_v1  ;;  %v1205_v7 = vmax.f32 %v1141_v2, 0.0  ;;  %v656_v8 = vpop.f32.mrf.mxu2  ;;  %v1047_v56 = vadd.f32 %v3044_v48, %v944_v49 }
 0x10f   : > { %v1364_v10 = vadd.f32 %v3059_v63, %v1299_v4  ;;  %v1269_v11 = vmul.f32 %v3055_v59, %v1204_v23  ;;  %v1108_v12 = vmul.f32 2.0, %v656_v8  ;;  %v769_v13 = vpop.f32.mrf.mxu3  ;;  %v1016_v61 = vadd.f32 %v3040_v47, %v3001_v32 }
 0x110   : > { %v1365_v15 = vadd.f32 %v3059_v63, %v1300_v6  ;;  %v1270_v17 = vmul.f32 %v3055_v59, %v1205_v7  ;;  %v1109_v18 = vmul.f32 2.0, %v769_v13  ;;  %v611_v19 = vpop.f32.mrf.mxu0 }
 0x111   : > { %v2412_v20 = vpop.eup %2411  ;;  %v1464_v21 = vmul.f32 1.442695, %v1364_v10  ;;  %v1334_v22 = vadd.f32 %v3059_v63, %v1269_v11  ;;  %v1172_v24 = vsub.f32 %v1044_v3, %v1108_v12  ;;  %v1078_v25 = vmul.f32 2.0, %v611_v19  ;;  %v724_v26 = vpop.f32.mrf.mxu1 }
 0x112   : > { %v2414_v29 = vpop.eup %2413  ;;  %1554 = vst [vmem:[%s2789_s12 + $0x110] sm:$0xff] %v2412_v20  ;;  %v1466_v30 = vmul.f32 1.442695, %v1365_v15  ;;  %v1335_v27 = vadd.f32 %v3059_v63, %v1270_v17  ;;  %v1173_v31 = vsub.f32 %v1045_v5, %v1109_v18  ;;  %v1079_v34 = vmul.f32 2.0, %v724_v26 }
 0x113   : > { %v2416_v35 = vpop.eup %2415  ;;  %1555 = vst [vmem:[%s2789_s12 + $0x118] sm:$0xff] %v2414_v29  ;;  %2419 = vpow2.f32 %v1464_v21  ;;  %v1404_v39 = vmul.f32 1.442695, %v1334_v22  ;;  %v1236_v40 = vmax.f32 %v1172_v24, 0.0  ;;  %v1142_v43 = vsub.f32 %v1014_v9, %v1078_v25  ;;  %v949_v24 = vpop.permute.xlu0 %948 }
 0x114   : > { %v2418_v44 = vpop.eup %2417  ;;  %1524 = vst [vmem:[%s2789_s12 + $0x20] sm:$0xff] %v2416_v35  ;;  %2421 = vpow2.f32 %v1466_v30  ;;  %v1406_v45 = vmul.f32 1.442695, %v1335_v27  ;;  %v1237_v51 = vmax.f32 %v1173_v31, 0.0  ;;  %v1143_v52 = vsub.f32 %v1015_v14, %v1079_v34 }
 0x115   : > { %1525 = vst [vmem:[%s2789_s12 + $0x28] sm:$0xff] %v2418_v44  ;;  %2423 = vpow2.f32 %v1404_v39  ;;  %v1301_v54 = vmul.f32 %v3055_v59, %v1236_v40  ;;  %v1206_v55 = vmax.f32 %v1142_v43, 0.0  ;;  %v1017_v3 = vadd.f32 %v3044_v48, %v3001_v32 }
 0x116   : > { %2425 = vpow2.f32 %v1406_v45  ;;  %v1302_v57 = vmul.f32 %v3055_v59, %v1237_v51  ;;  %v1207_v58 = vmax.f32 %v1143_v52, 0.0  ;;  %v659_v60 = vpop.f32.mrf.mxu2  ;;  %v1048_v30 = vadd.f32 %v3040_v47, %v949_v24 }
 0x117   : > { %v1366_v62 = vadd.f32 %v3059_v63, %v1301_v54  ;;  %v1271_v0 = vmul.f32 %v3055_v59, %v1206_v55  ;;  %v1110_v1 = vmul.f32 2.0, %v659_v60  ;;  %v772_v2 = vpop.f32.mrf.mxu3  ;;  %v1049_v34 = vadd.f32 %v3044_v48, %v949_v24 }
 0x118   : > { %v1367_v4 = vadd.f32 %v3059_v63, %v1302_v57  ;;  %v1272_v23 = vmul.f32 %v3055_v59, %v1207_v58  ;;  %v1111_v5 = vmul.f32 2.0, %v772_v2  ;;  %v614_v6 = vpop.f32.mrf.mxu0  ;;  %v1018_v43 = vadd.f32 %v3040_v47, %v3013_v36 }
 0x119   : > { %v2420_v7 = vpop.eup %2419  ;;  %v1468_v8 = vmul.f32 1.442695, %v1366_v62  ;;  %v1336_v9 = vadd.f32 %v3059_v63, %v1271_v0  ;;  %v1174_v10 = vsub.f32 %v1046_v28, %v1110_v1  ;;  %v1080_v11 = vmul.f32 2.0, %v614_v6  ;;  %v727_v12 = vpop.f32.mrf.mxu1 }
 0x11a   : > { %v2422_v13 = vpop.eup %2421  ;;  %1556 = vst [vmem:[%s2789_s12 + $0x120] sm:$0xff] %v2420_v7  ;;  %v1470_v14 = vmul.f32 1.442695, %v1367_v4  ;;  %v1337_v32 = vadd.f32 %v3059_v63, %v1272_v23  ;;  %v1175_v15 = vsub.f32 %v1047_v56, %v1111_v5  ;;  %v1081_v17 = vmul.f32 2.0, %v727_v12 }
 0x11b   : > { %v2424_v18 = vpop.eup %2423  ;;  %1557 = vst [vmem:[%s2789_s12 + $0x128] sm:$0xff] %v2422_v13  ;;  %2427 = vpow2.f32 %v1468_v8  ;;  %v1408_v19 = vmul.f32 1.442695, %v1336_v9  ;;  %v1238_v20 = vmax.f32 %v1174_v10, 0.0  ;;  %v1144_v21 = vsub.f32 %v1016_v61, %v1080_v11 }
 0x11c   : > { %v2426_v22 = vpop.eup %2425  ;;  %1526 = vst [vmem:[%s2789_s12 + $0x30] sm:$0xff] %v2424_v18  ;;  %2429 = vpow2.f32 %v1470_v14  ;;  %v1410_v25 = vmul.f32 1.442695, %v1337_v32  ;;  %v1239_v26 = vmax.f32 %v1175_v15, 0.0  ;;  %v1145_v29 = vsub.f32 %v1017_v3, %v1081_v17  ;;  %v954_v15 = vpop.permute.xlu1 %953 }
 0x11d   : > { %1527 = vst [vmem:[%s2789_s12 + $0x38] sm:$0xff] %v2426_v22  ;;  %2431 = vpow2.f32 %v1408_v19  ;;  %v1303_v27 = vmul.f32 %v3055_v59, %v1238_v20  ;;  %v1208_v31 = vmax.f32 %v1144_v21, 0.0  ;;  %v1019_v52 = vadd.f32 %v3044_v48, %v3013_v36 }
 0x11e   : > { %2433 = vpow2.f32 %v1410_v25  ;;  %v1304_v35 = vmul.f32 %v3055_v59, %v1239_v26  ;;  %v1209_v39 = vmax.f32 %v1145_v29, 0.0  ;;  %v662_v40 = vpop.f32.mrf.mxu2  ;;  %v1020_v12 = vadd.f32 %v3040_v47, %v3007_v33 }
 0x11f   : > { %v1368_v44 = vadd.f32 %v3059_v63, %v1303_v27  ;;  %v1273_v45 = vmul.f32 %v3055_v59, %v1208_v31  ;;  %v1112_v49 = vmul.f32 2.0, %v662_v40  ;;  %v775_v51 = vpop.f32.mrf.mxu3  ;;  %v1021_v32 = vadd.f32 %v3044_v48, %v3007_v33 }
 0x120   : > { %v1369_v28 = vadd.f32 %v3059_v63, %v1304_v35  ;;  %v1274_v54 = vmul.f32 %v3055_v59, %v1209_v39  ;;  %v1113_v55 = vmul.f32 2.0, %v775_v51  ;;  %v617_v56 = vpop.f32.mrf.mxu0  ;;  %v1050_v20 = vadd.f32 %v3040_v47, %v954_v15 }
 0x121   : > { %v2428_v57 = vpop.eup %2427  ;;  %v1472_v58 = vmul.f32 1.442695, %v1368_v44  ;;  %v1338_v60 = vadd.f32 %v3059_v63, %v1273_v45  ;;  %v1176_v61 = vsub.f32 %v1048_v30, %v1112_v49  ;;  %v1082_v62 = vmul.f32 2.0, %v617_v56  ;;  %v730_v0 = vpop.f32.mrf.mxu1 }
 0x122   : > { %v2430_v1 = vpop.eup %2429  ;;  %1558 = vst [vmem:[%s2789_s12 + $0x130] sm:$0xff] %v2428_v57  ;;  %v1474_v2 = vmul.f32 1.442695, %v1369_v28  ;;  %v1339_v36 = vadd.f32 %v3059_v63, %v1274_v54  ;;  %v1177_v3 = vsub.f32 %v1049_v34, %v1113_v55  ;;  %v1083_v4 = vmul.f32 2.0, %v730_v0 }
 0x123   : > { %v2432_v23 = vpop.eup %2431  ;;  %1559 = vst [vmem:[%s2789_s12 + $0x138] sm:$0xff] %v2430_v1  ;;  %2435 = vpow2.f32 %v1472_v58  ;;  %v1412_v5 = vmul.f32 1.442695, %v1338_v60  ;;  %v1240_v6 = vmax.f32 %v1176_v61, 0.0  ;;  %v1146_v7 = vsub.f32 %v1018_v43, %v1082_v62 }
 0x124   : > { %v2434_v8 = vpop.eup %2433  ;;  %1528 = vst [vmem:[%s2789_s12 + $0x40] sm:$0xff] %v2432_v23  ;;  %2437 = vpow2.f32 %v1474_v2  ;;  %v1414_v9 = vmul.f32 1.442695, %v1339_v36  ;;  %v1241_v10 = vmax.f32 %v1177_v3, 0.0  ;;  %v1147_v11 = vsub.f32 %v1019_v52, %v1083_v4  ;;  %v959_v36 = vpop.permute.xlu2 %958 }
 0x125   : > { %1529 = vst [vmem:[%s2789_s12 + $0x48] sm:$0xff] %v2434_v8  ;;  %2439 = vpow2.f32 %v1412_v5  ;;  %v1305_v13 = vmul.f32 %v3055_v59, %v1240_v6  ;;  %v1210_v14 = vmax.f32 %v1146_v7, 0.0  ;;  %v1051_v26 = vadd.f32 %v3044_v48, %v954_v15 }
 0x126   : > { %2441 = vpow2.f32 %v1414_v9  ;;  %v1306_v17 = vmul.f32 %v3055_v59, %v1241_v10  ;;  %v1211_v18 = vmax.f32 %v1147_v11, 0.0  ;;  %v665_v19 = vpop.f32.mrf.mxu2  ;;  %v1022_v62 = vadd.f32 %v3040_v47, %v3017_v37 }
 0x127   : > { %v1370_v21 = vadd.f32 %v3059_v63, %v1305_v13  ;;  %v1275_v22 = vmul.f32 %v3055_v59, %v1210_v14  ;;  %v1114_v24 = vmul.f32 2.0, %v665_v19  ;;  %v778_v25 = vpop.f32.mrf.mxu3  ;;  %v1023_v2 = vadd.f32 %v3044_v48, %v3017_v37 }
 0x128   : > { %v1371_v29 = vadd.f32 %v3059_v63, %v1306_v17  ;;  %v1276_v33 = vmul.f32 %v3055_v59, %v1211_v18  ;;  %v1115_v30 = vmul.f32 2.0, %v778_v25  ;;  %v620_v27 = vpop.f32.mrf.mxu0  ;;  %v1052_v5 = vadd.f32 %v3040_v47, %v959_v36 }
 0x129   : > { %v2436_v31 = vpop.eup %2435  ;;  %v1476_v34 = vmul.f32 1.442695, %v1370_v21  ;;  %v1340_v35 = vadd.f32 %v3059_v63, %v1275_v22  ;;  %v1178_v39 = vsub.f32 %v1050_v20, %v1114_v24  ;;  %v1084_v40 = vmul.f32 2.0, %v620_v27  ;;  %v733_v43 = vpop.f32.mrf.mxu1 }
 0x12a   : > { %v2438_v44 = vpop.eup %2437  ;;  %1560 = vst [vmem:[%s2789_s12 + $0x140] sm:$0xff] %v2436_v31  ;;  %v1478_v45 = vmul.f32 1.442695, %v1371_v29  ;;  %v1341_v49 = vadd.f32 %v3059_v63, %v1276_v33  ;;  %v1179_v51 = vsub.f32 %v1051_v26, %v1115_v30  ;;  %v1085_v52 = vmul.f32 2.0, %v733_v43 }
 0x12b   : > { %v2440_v28 = vpop.eup %2439  ;;  %1561 = vst [vmem:[%s2789_s12 + $0x148] sm:$0xff] %v2438_v44  ;;  %2443 = vpow2.f32 %v1476_v34  ;;  %v1416_v54 = vmul.f32 1.442695, %v1340_v35  ;;  %v1242_v55 = vmax.f32 %v1178_v39, 0.0  ;;  %v1148_v56 = vsub.f32 %v1020_v12, %v1084_v40 }
 0x12c   : > { %v2442_v57 = vpop.eup %2441  ;;  %1530 = vst [vmem:[%s2789_s12 + $0x50] sm:$0xff] %v2440_v28  ;;  %2445 = vpow2.f32 %v1478_v45  ;;  %v1418_v58 = vmul.f32 1.442695, %v1341_v49  ;;  %v1243_v60 = vmax.f32 %v1179_v51, 0.0  ;;  %v1149_v61 = vsub.f32 %v1021_v32, %v1085_v52  ;;  %v964_v45 = vpop.permute.xlu0 %963 }
 0x12d   : > { %1531 = vst [vmem:[%s2789_s12 + $0x58] sm:$0xff] %v2442_v57  ;;  %2447 = vpow2.f32 %v1416_v54  ;;  %v1307_v0 = vmul.f32 %v3055_v59, %v1242_v55  ;;  %v1212_v1 = vmax.f32 %v1148_v56, 0.0  ;;  %v1053_v10 = vadd.f32 %v3044_v48, %v959_v36 }
 0x12e   : > { %2449 = vpow2.f32 %v1418_v58  ;;  %v1308_v3 = vmul.f32 %v3055_v59, %v1243_v60  ;;  %v1213_v4 = vmax.f32 %v1149_v61, 0.0  ;;  %v668_v23 = vpop.f32.mrf.mxu2  ;;  %v1024_v39 = vadd.f32 %v3040_v47, %v3027_v41 }
 0x12f   : > { %v1372_v6 = vadd.f32 %v3059_v63, %v1307_v0  ;;  %v1277_v7 = vmul.f32 %v3055_v59, %v1212_v1  ;;  %v1116_v8 = vmul.f32 2.0, %v668_v23  ;;  %v781_v9 = vpop.f32.mrf.mxu3  ;;  %v1025_v44 = vadd.f32 %v3044_v48, %v3027_v41 }
 0x130   : > { %v1373_v11 = vadd.f32 %v3059_v63, %v1308_v3  ;;  %v1278_v37 = vmul.f32 %v3055_v59, %v1213_v4  ;;  %v1117_v12 = vmul.f32 2.0, %v781_v9  ;;  %v623_v13 = vpop.f32.mrf.mxu0  ;;  %v1054_v28 = vadd.f32 %v3040_v47, %v964_v45 }
 0x131   : > { %v2444_v14 = vpop.eup %2443  ;;  %v1480_v32 = vmul.f32 1.442695, %v1372_v6  ;;  %v1342_v15 = vadd.f32 %v3059_v63, %v1277_v7  ;;  %v1180_v17 = vsub.f32 %v1052_v5, %v1116_v8  ;;  %v1086_v18 = vmul.f32 2.0, %v623_v13  ;;  %v736_v19 = vpop.f32.mrf.mxu1 }
 0x132   : > { %v2446_v20 = vpop.eup %2445  ;;  %1562 = vst [vmem:[%s2789_s12 + $0x150] sm:$0xff] %v2444_v14  ;;  %v1482_v21 = vmul.f32 1.442695, %v1373_v11  ;;  %v1343_v22 = vadd.f32 %v3059_v63, %v1278_v37  ;;  %v1181_v24 = vsub.f32 %v1053_v10, %v1117_v12  ;;  %v1087_v25 = vmul.f32 2.0, %v736_v19 }
 0x133   : > { %v2448_v26 = vpop.eup %2447  ;;  %1563 = vst [vmem:[%s2789_s12 + $0x158] sm:$0xff] %v2446_v20  ;;  %2451 = vpow2.f32 %v1480_v32  ;;  %v1420_v29 = vmul.f32 1.442695, %v1342_v15  ;;  %v1244_v33 = vmax.f32 %v1180_v17, 0.0  ;;  %v1150_v30 = vsub.f32 %v1022_v62, %v1086_v18  ;;  %v969_v20 = vpop.permute.xlu1 %968 }
 0x134   : > { %v2450_v27 = vpop.eup %2449  ;;  %1532 = vst [vmem:[%s2789_s12 + $0x60] sm:$0xff] %v2448_v26  ;;  %2453 = vpow2.f32 %v1482_v21  ;;  %v1422_v31 = vmul.f32 1.442695, %v1343_v22  ;;  %v1245_v34 = vmax.f32 %v1181_v24, 0.0  ;;  %v1151_v35 = vsub.f32 %v1023_v2, %v1087_v25 }
 0x135   : > { %1533 = vst [vmem:[%s2789_s12 + $0x68] sm:$0xff] %v2450_v27  ;;  %2455 = vpow2.f32 %v1420_v29  ;;  %v1309_v40 = vmul.f32 %v3055_v59, %v1244_v33  ;;  %v1214_v43 = vmax.f32 %v1150_v30, 0.0  ;;  %v1055_v58 = vadd.f32 %v3044_v48, %v964_v45 }
 0x136   : > { %2457 = vpow2.f32 %v1422_v31  ;;  %v1310_v49 = vmul.f32 %v3055_v59, %v1245_v34  ;;  %v1215_v51 = vmax.f32 %v1151_v35, 0.0  ;;  %v671_v52 = vpop.f32.mrf.mxu2  ;;  %v1026_v15 = vadd.f32 %v3040_v47, %v3019_v38 }
 0x137   : > { %v1374_v54 = vadd.f32 %v3059_v63, %v1309_v40  ;;  %v1279_v55 = vmul.f32 %v3055_v59, %v1214_v43  ;;  %v1118_v56 = vmul.f32 2.0, %v671_v52  ;;  %v784_v57 = vpop.f32.mrf.mxu3  ;;  %v1027_v19 = vadd.f32 %v3044_v48, %v3019_v38 }
 0x138   : > { %v1375_v60 = vadd.f32 %v3059_v63, %v1310_v49  ;;  %v1280_v41 = vmul.f32 %v3055_v59, %v1215_v51  ;;  %v1119_v61 = vmul.f32 2.0, %v784_v57  ;;  %v626_v62 = vpop.f32.mrf.mxu0  ;;  %v1056_v25 = vadd.f32 %v3040_v47, %v969_v20 }
 0x139   : > { %v2452_v0 = vpop.eup %2451  ;;  %v1484_v1 = vmul.f32 1.442695, %v1374_v54  ;;  %v1344_v2 = vadd.f32 %v3059_v63, %v1279_v55  ;;  %v1182_v36 = vsub.f32 %v1054_v28, %v1118_v56  ;;  %v1088_v3 = vmul.f32 2.0, %v626_v62  ;;  %v739_v4 = vpop.f32.mrf.mxu1 }
 0x13a   : > { %v2454_v23 = vpop.eup %2453  ;;  %1564 = vst [vmem:[%s2789_s12 + $0x160] sm:$0xff] %v2452_v0  ;;  %v1486_v5 = vmul.f32 1.442695, %v1375_v60  ;;  %v1345_v6 = vadd.f32 %v3059_v63, %v1280_v41  ;;  %v1183_v7 = vsub.f32 %v1055_v58, %v1119_v61  ;;  %v1089_v8 = vmul.f32 2.0, %v739_v4  ;;  %v974_v4 = vpop.permute.xlu2 %973 }
 0x13b   : > { %v2456_v9 = vpop.eup %2455  ;;  %1565 = vst [vmem:[%s2789_s12 + $0x168] sm:$0xff] %v2454_v23  ;;  %2459 = vpow2.f32 %v1484_v1  ;;  %v1424_v10 = vmul.f32 1.442695, %v1344_v2  ;;  %v1246_v11 = vmax.f32 %v1182_v36, 0.0  ;;  %v1152_v37 = vsub.f32 %v1024_v39, %v1088_v3 }
 0x13c   : > { %v2458_v12 = vpop.eup %2457  ;;  %1534 = vst [vmem:[%s2789_s12 + $0x70] sm:$0xff] %v2456_v9  ;;  %2461 = vpow2.f32 %v1486_v5  ;;  %v1426_v13 = vmul.f32 1.442695, %v1345_v6  ;;  %v1247_v14 = vmax.f32 %v1183_v7, 0.0  ;;  %v1153_v32 = vsub.f32 %v1025_v44, %v1089_v8 }
 0x13d   : > { %1535 = vst [vmem:[%s2789_s12 + $0x78] sm:$0xff] %v2458_v12  ;;  %2463 = vpow2.f32 %v1424_v10  ;;  %v1311_v17 = vmul.f32 %v3055_v59, %v1246_v11  ;;  %v1216_v18 = vmax.f32 %v1152_v37, 0.0  ;;  %v1057_v27 = vadd.f32 %v3044_v48, %v969_v20 }
 0x13e   : > { %2465 = vpow2.f32 %v1426_v13  ;;  %v1312_v21 = vmul.f32 %v3055_v59, %v1247_v14  ;;  %v1217_v22 = vmax.f32 %v1153_v32, 0.0  ;;  %v674_v24 = vpop.f32.mrf.mxu2  ;;  %v1028_v1 = vadd.f32 %v3040_v47, %v3029_v42 }
 0x13f   : > { %v1376_v26 = vadd.f32 %v3059_v63, %v1311_v17  ;;  %v1281_v29 = vmul.f32 %v3055_v59, %v1216_v18  ;;  %v1120_v33 = vmul.f32 2.0, %v674_v24  ;;  %v787_v30 = vpop.f32.mrf.mxu3  ;;  %v1029_v3 = vadd.f32 %v3044_v48, %v3029_v42 }
 0x140   : > { %v1377_v31 = vadd.f32 %v3059_v63, %v1312_v21  ;;  %v1282_v38 = vmul.f32 %v3055_v59, %v1217_v22  ;;  %v1121_v34 = vmul.f32 2.0, %v787_v30  ;;  %v629_v35 = vpop.f32.mrf.mxu0  ;;  %v1058_v7 = vadd.f32 %v3040_v47, %v974_v4 }
 0x141   : > { %v2460_v39 = vpop.eup %2459  ;;  %v1488_v40 = vmul.f32 1.442695, %v1376_v26  ;;  %v1346_v43 = vadd.f32 %v3059_v63, %v1281_v29  ;;  %v1184_v44 = vsub.f32 %v1056_v25, %v1120_v33  ;;  %v1090_v45 = vmul.f32 2.0, %v629_v35  ;;  %v742_v49 = vpop.f32.mrf.mxu1 }
 0x142   : > { %v2462_v51 = vpop.eup %2461  ;;  %1566 = vst [vmem:[%s2789_s12 + $0x170] sm:$0xff] %v2460_v39  ;;  %v1490_v52 = vmul.f32 1.442695, %v1377_v31  ;;  %v1347_v28 = vadd.f32 %v3059_v63, %v1282_v38  ;;  %v1185_v54 = vsub.f32 %v1057_v27, %v1121_v34  ;;  %v1091_v55 = vmul.f32 2.0, %v742_v49 }
 0x143   : > { %v2464_v56 = vpop.eup %2463  ;;  %1567 = vst [vmem:[%s2789_s12 + $0x178] sm:$0xff] %v2462_v51  ;;  %2467 = vpow2.f32 %v1488_v40  ;;  %v1428_v57 = vmul.f32 1.442695, %v1346_v43  ;;  %v1248_v58 = vmax.f32 %v1184_v44, 0.0  ;;  %v1154_v60 = vsub.f32 %v1026_v15, %v1090_v45  ;;  %v979_v45 = vpop.permute.xlu0 %978 }
 0x144   : > { %v2466_v41 = vpop.eup %2465  ;;  %1536 = vst [vmem:[%s2789_s12 + $0x80] sm:$0xff] %v2464_v56  ;;  %2469 = vpow2.f32 %v1490_v52  ;;  %v1430_v61 = vmul.f32 1.442695, %v1347_v28  ;;  %v1249_v62 = vmax.f32 %v1185_v54, 0.0  ;;  %v1155_v0 = vsub.f32 %v1027_v19, %v1091_v55 }
 0x145   : > { %1537 = vst [vmem:[%s2789_s12 + $0x88] sm:$0xff] %v2466_v41  ;;  %2471 = vpow2.f32 %v1428_v57  ;;  %v1313_v2 = vmul.f32 %v3055_v59, %v1248_v58  ;;  %v1218_v36 = vmax.f32 %v1154_v60, 0.0  ;;  %v1059_v37 = vadd.f32 %v3044_v48, %v974_v4 }
 0x146   : > { %2473 = vpow2.f32 %v1430_v61  ;;  %v1314_v23 = vmul.f32 %v3055_v59, %v1249_v62  ;;  %v1219_v5 = vmax.f32 %v1155_v0, 0.0  ;;  %v677_v6 = vpop.f32.mrf.mxu2  ;;  %v1030_v39 = vadd.f32 %v3040_v47, %v3049_v50 }
 0x147   : > { %v1378_v8 = vadd.f32 %v3059_v63, %v1313_v2  ;;  %v1283_v9 = vmul.f32 %v3055_v59, %v1218_v36  ;;  %v1122_v10 = vmul.f32 2.0, %v677_v6  ;;  %v790_v11 = vpop.f32.mrf.mxu3  ;;  %v1031_v44 = vadd.f32 %v3044_v48, %v3049_v50 }
 0x148   : > { %v1379_v12 = vadd.f32 %v3059_v63, %v1314_v23  ;;  %v1284_v42 = vmul.f32 %v3055_v59, %v1219_v5  ;;  %v1123_v13 = vmul.f32 2.0, %v790_v11  ;;  %v632_v14 = vpop.f32.mrf.mxu0  ;;  %v1060_v28 = vadd.f32 %v3040_v47, %v979_v45 }
 0x149   : > { %v2468_v32 = vpop.eup %2467  ;;  %v1492_v15 = vmul.f32 1.442695, %v1378_v8  ;;  %v1348_v17 = vadd.f32 %v3059_v63, %v1283_v9  ;;  %v1186_v18 = vsub.f32 %v1058_v7, %v1122_v10  ;;  %v1092_v19 = vmul.f32 2.0, %v632_v14  ;;  %v745_v20 = vpop.f32.mrf.mxu1 }
 0x14a   : > { %v2470_v21 = vpop.eup %2469  ;;  %1568 = vst [vmem:[%s2789_s12 + $0x180] sm:$0xff] %v2468_v32  ;;  %v1494_v22 = vmul.f32 1.442695, %v1379_v12  ;;  %v1349_v24 = vadd.f32 %v3059_v63, %v1284_v42  ;;  %v1187_v25 = vsub.f32 %v1059_v37, %v1123_v13  ;;  %v1093_v26 = vmul.f32 2.0, %v745_v20 }
 0x14b   : > { %v2472_v29 = vpop.eup %2471  ;;  %1569 = vst [vmem:[%s2789_s12 + $0x188] sm:$0xff] %v2470_v21  ;;  %2475 = vpow2.f32 %v1492_v15  ;;  %v1432_v33 = vmul.f32 1.442695, %v1348_v17  ;;  %v1250_v30 = vmax.f32 %v1186_v18, 0.0  ;;  %v1156_v27 = vsub.f32 %v1028_v1, %v1092_v19  ;;  %v984_v18 = vpop.permute.xlu1 %983 }
 0x14c   : > { %v2474_v31 = vpop.eup %2473  ;;  %1538 = vst [vmem:[%s2789_s12 + $0x90] sm:$0xff] %v2472_v29  ;;  %2477 = vpow2.f32 %v1494_v22  ;;  %v1434_v38 = vmul.f32 1.442695, %v1349_v24  ;;  %v1251_v34 = vmax.f32 %v1187_v25, 0.0  ;;  %v1157_v35 = vsub.f32 %v1029_v3, %v1093_v26 }
 0x14d   : > { %1539 = vst [vmem:[%s2789_s12 + $0x98] sm:$0xff] %v2474_v31  ;;  %2479 = vpow2.f32 %v1432_v33  ;;  %v1315_v40 = vmul.f32 %v3055_v59, %v1250_v30  ;;  %v1220_v43 = vmax.f32 %v1156_v27, 0.0  ;;  %v1061_v58 = vadd.f32 %v3044_v48, %v979_v45 }
 0x14e   : > { %2481 = vpow2.f32 %v1434_v38  ;;  %v1316_v49 = vmul.f32 %v3055_v59, %v1251_v34  ;;  %v1221_v51 = vmax.f32 %v1157_v35, 0.0  ;;  %v680_v52 = vpop.f32.mrf.mxu2  ;;  %v1032_v14 = vadd.f32 %v3040_v47, %v3038_v46 }
 0x14f   : > { %v1380_v54 = vadd.f32 %v3059_v63, %v1315_v40  ;;  %v1285_v55 = vmul.f32 %v3055_v59, %v1220_v43  ;;  %v1124_v56 = vmul.f32 2.0, %v680_v52  ;;  %v793_v57 = vpop.f32.mrf.mxu3  ;;  %v1033_v17 = vadd.f32 %v3044_v48, %v3038_v46 }
 0x150   : > { %v1381_v60 = vadd.f32 %v3059_v63, %v1316_v49  ;;  %v1286_v50 = vmul.f32 %v3055_v59, %v1221_v51  ;;  %v1125_v41 = vmul.f32 2.0, %v793_v57  ;;  %v635_v61 = vpop.f32.mrf.mxu0  ;;  %v1062_v22 = vadd.f32 %v3040_v47, %v984_v18 }
 0x151   : > { %v2476_v62 = vpop.eup %2475  ;;  %v1496_v0 = vmul.f32 1.442695, %v1380_v54  ;;  %v1350_v1 = vadd.f32 %v3059_v63, %v1285_v55  ;;  %v1188_v2 = vsub.f32 %v1060_v28, %v1124_v56  ;;  %v1094_v36 = vmul.f32 2.0, %v635_v61  ;;  %v748_v3 = vpop.f32.mrf.mxu1 }
 0x152   : > { %v2478_v4 = vpop.eup %2477  ;;  %1570 = vst [vmem:[%s2789_s12 + $0x190] sm:$0xff] %v2476_v62  ;;  %v1498_v23 = vmul.f32 1.442695, %v1381_v60  ;;  %v1351_v5 = vadd.f32 %v3059_v63, %v1286_v50  ;;  %v1189_v6 = vsub.f32 %v1061_v58, %v1125_v41  ;;  %v1095_v7 = vmul.f32 2.0, %v748_v3  ;;  %v989_v58 = vpop.permute.xlu2 %988 }
 0x153   : > { %v2480_v8 = vpop.eup %2479  ;;  %1571 = vst [vmem:[%s2789_s12 + $0x198] sm:$0xff] %v2478_v4  ;;  %2483 = vpow2.f32 %v1496_v0  ;;  %v1436_v9 = vmul.f32 1.442695, %v1350_v1  ;;  %v1252_v10 = vmax.f32 %v1188_v2, 0.0  ;;  %v1158_v11 = vsub.f32 %v1030_v39, %v1094_v36 }
 0x154   : > { %v2482_v37 = vpop.eup %2481  ;;  %1540 = vst [vmem:[%s2789_s12 + $0xa0] sm:$0xff] %v2480_v8  ;;  %2485 = vpow2.f32 %v1498_v23  ;;  %v1438_v12 = vmul.f32 1.442695, %v1351_v5  ;;  %v1253_v42 = vmax.f32 %v1189_v6, 0.0  ;;  %v1159_v13 = vsub.f32 %v1031_v44, %v1095_v7 }
 0x155   : > { %1541 = vst [vmem:[%s2789_s12 + $0xa8] sm:$0xff] %v2482_v37  ;;  %2487 = vpow2.f32 %v1436_v9  ;;  %v1317_v32 = vmul.f32 %v3055_v59, %v1252_v10  ;;  %v1222_v15 = vmax.f32 %v1158_v11, 0.0  ;;  %v1063_v33 = vadd.f32 %v3044_v48, %v984_v18 }
 0x156   : > { %2489 = vpow2.f32 %v1438_v12  ;;  %v1318_v19 = vmul.f32 %v3055_v59, %v1253_v42  ;;  %v1223_v20 = vmax.f32 %v1159_v13, 0.0  ;;  %v683_v21 = vpop.f32.mrf.mxu2  ;;  %v1034_v61 = vadd.f32 %v3040_v47, %v3052_v53 }
 0x157   : > { %v1382_v24 = vadd.f32 %v3059_v63, %v1317_v32  ;;  %v1287_v25 = vmul.f32 %v3055_v59, %v1222_v15  ;;  %v1126_v26 = vmul.f32 2.0, %v683_v21  ;;  %v796_v29 = vpop.f32.mrf.mxu3  ;;  %v1035_v1 = vadd.f32 %v3044_v48, %v3052_v53 }
 0x158   : > { %v1383_v30 = vadd.f32 %v3059_v63, %v1318_v19  ;;  %v1288_v46 = vmul.f32 %v3055_v59, %v1223_v20  ;;  %v1127_v27 = vmul.f32 2.0, %v796_v29  ;;  %v638_v31 = vpop.f32.mrf.mxu0  ;;  %v1064_v4 = vadd.f32 %v3040_v47, %v989_v58  ;;  %v994_v29 = vpop.permute.xlu0 %993 }
 0x159   : > { %v2484_v38 = vpop.eup %2483  ;;  %v1500_v34 = vmul.f32 1.442695, %v1382_v24  ;;  %v1352_v35 = vadd.f32 %v3059_v63, %v1287_v25  ;;  %v1190_v39 = vsub.f32 %v1062_v22, %v1126_v26  ;;  %v1096_v40 = vmul.f32 2.0, %v638_v31  ;;  %v751_v43 = vpop.f32.mrf.mxu1 }
 0x15a   : > { %v2486_v44 = vpop.eup %2485  ;;  %1572 = vst [vmem:[%s2789_s12 + $0x1a0] sm:$0xff] %v2484_v38  ;;  %v1502_v45 = vmul.f32 1.442695, %v1383_v30  ;;  %v1353_v49 = vadd.f32 %v3059_v63, %v1288_v46  ;;  %v1191_v51 = vsub.f32 %v1063_v33, %v1127_v27  ;;  %v1097_v52 = vmul.f32 2.0, %v751_v43 }
 0x15b   : > { %v2488_v28 = vpop.eup %2487  ;;  %1573 = vst [vmem:[%s2789_s12 + $0x1a8] sm:$0xff] %v2486_v44  ;;  %2491 = vpow2.f32 %v1500_v34  ;;  %v1440_v54 = vmul.f32 1.442695, %v1352_v35  ;;  %v1254_v55 = vmax.f32 %v1190_v39, 0.0  ;;  %v1160_v56 = vsub.f32 %v1032_v14, %v1096_v40 }
 0x15c   : > { %v2490_v57 = vpop.eup %2489  ;;  %1542 = vst [vmem:[%s2789_s12 + $0xb0] sm:$0xff] %v2488_v28  ;;  %2493 = vpow2.f32 %v1502_v45  ;;  %v1442_v60 = vmul.f32 1.442695, %v1353_v49  ;;  %v1255_v50 = vmax.f32 %v1191_v51, 0.0  ;;  %v1161_v41 = vsub.f32 %v1033_v17, %v1097_v52 }
 0x15d   : > { %1543 = vst [vmem:[%s2789_s12 + $0xb8] sm:$0xff] %v2490_v57  ;;  %2495 = vpow2.f32 %v1440_v54  ;;  %v1319_v62 = vmul.f32 %v3055_v59, %v1254_v55  ;;  %v1224_v0 = vmax.f32 %v1160_v56, 0.0  ;;  %v1065_v8 = vadd.f32 %v3044_v48, %v989_v58 }
 0x15e   : > { %2497 = vpow2.f32 %v1442_v60  ;;  %v1320_v2 = vmul.f32 %v3055_v59, %v1255_v50  ;;  %v1225_v36 = vmax.f32 %v1161_v41, 0.0  ;;  %v686_v3 = vpop.f32.mrf.mxu2  ;;  %v1036_v27 = vadd.f32 %v3040_v47, %v3068_v16 }
 0x15f   : > { %v1384_v23 = vadd.f32 %v3059_v63, %v1319_v62  ;;  %v1289_v5 = vmul.f32 %v3055_v59, %v1224_v0  ;;  %v1128_v6 = vmul.f32 2.0, %v686_v3  ;;  %v799_v7 = vpop.f32.mrf.mxu3  ;;  %v1037_v34 = vadd.f32 %v3044_v48, %v3068_v16 }
 0x160   : > { %v1385_v9 = vadd.f32 %v3059_v63, %v1320_v2  ;;  %v1290_v53 = vmul.f32 %v3055_v59, %v1225_v36  ;;  %v1129_v10 = vmul.f32 2.0, %v799_v7  ;;  %v641_v11 = vpop.f32.mrf.mxu0  ;;  %v1066_v43 = vadd.f32 %v3040_v47, %v994_v29 }
 0x161   : > { %v2492_v37 = vpop.eup %2491  ;;  %v1504_v12 = vmul.f32 1.442695, %v1384_v23  ;;  %v1354_v42 = vadd.f32 %v3059_v63, %v1289_v5  ;;  %v1192_v13 = vsub.f32 %v1064_v4, %v1128_v6  ;;  %v1098_v14 = vmul.f32 2.0, %v641_v11  ;;  %v754_v32 = vpop.f32.mrf.mxu1 }
 0x162   : > { %v2494_v15 = vpop.eup %2493  ;;  %1574 = vst [vmem:[%s2789_s12 + $0x1b0] sm:$0xff] %v2492_v37  ;;  %v1506_v17 = vmul.f32 1.442695, %v1385_v9  ;;  %v1355_v18 = vadd.f32 %v3059_v63, %v1290_v53  ;;  %v1193_v19 = vsub.f32 %v1065_v8, %v1129_v10  ;;  %v1099_v20 = vmul.f32 2.0, %v754_v32  ;;  %v999_v6 = vpop.permute.xlu1 %998 }
 0x163   : > { %v2496_v21 = vpop.eup %2495  ;;  %1575 = vst [vmem:[%s2789_s12 + $0x1b8] sm:$0xff] %v2494_v15  ;;  %2499 = vpow2.f32 %v1504_v12  ;;  %v1444_v22 = vmul.f32 1.442695, %v1354_v42  ;;  %v1256_v24 = vmax.f32 %v1192_v13, 0.0  ;;  %v1162_v25 = vsub.f32 %v1034_v61, %v1098_v14 }
 0x164   : > { %v2498_v26 = vpop.eup %2497  ;;  %1544 = vst [vmem:[%s2789_s12 + $0xc0] sm:$0xff] %v2496_v21  ;;  %2501 = vpow2.f32 %v1506_v17  ;;  %v1446_v33 = vmul.f32 1.442695, %v1355_v18  ;;  %v1257_v30 = vmax.f32 %v1193_v19, 0.0  ;;  %v1163_v46 = vsub.f32 %v1035_v1, %v1099_v20 }
 0x165   : > { %1545 = vst [vmem:[%s2789_s12 + $0xc8] sm:$0xff] %v2498_v26  ;;  %2503 = vpow2.f32 %v1444_v22  ;;  %v1321_v31 = vmul.f32 %v3055_v59, %v1256_v24  ;;  %v1226_v38 = vmax.f32 %v1162_v25, 0.0  ;;  %v1067_v52 = vadd.f32 %v3044_v48, %v994_v29 }
 0x166   : > { %2505 = vpow2.f32 %v1446_v33  ;;  %v1322_v35 = vmul.f32 %v3055_v59, %v1257_v30  ;;  %v1227_v39 = vmax.f32 %v1163_v46, 0.0  ;;  %v689_v40 = vpop.f32.mrf.mxu2  ;;  %v1068_v42 = vadd.f32 %v3040_v47, %v999_v6 }
 0x167   : > { %v1386_v44 = vadd.f32 %v3059_v63, %v1321_v31  ;;  %v1291_v45 = vmul.f32 %v3055_v59, %v1226_v38  ;;  %v1130_v49 = vmul.f32 2.0, %v689_v40  ;;  %v802_v51 = vpop.f32.mrf.mxu3  ;;  %v1069_v17 = vadd.f32 %v3044_v48, %v999_v6 }
 0x168   : > { %v1387_v28 = vadd.f32 %v3059_v63, %v1322_v35  ;;  %v1292_v16 = vmul.f32 %v3055_v59, %v1227_v39  ;;  %v1131_v54 = vmul.f32 2.0, %v802_v51  ;;  %v644_v55 = vpop.f32.mrf.mxu0 }
 0x169   : > { %v2500_v56 = vpop.eup %2499  ;;  %v1508_v57 = vmul.f32 1.442695, %v1386_v44  ;;  %v1356_v58 = vadd.f32 %v3059_v63, %v1291_v45  ;;  %v1194_v60 = vsub.f32 %v1066_v43, %v1130_v49  ;;  %v1100_v50 = vmul.f32 2.0, %v644_v55  ;;  %v757_v41 = vpop.f32.mrf.mxu1 }
 0x16a   : > { %v2502_v61 = vpop.eup %2501  ;;  %1576 = vst [vmem:[%s2789_s12 + $0x1c0] sm:$0xff] %v2500_v56  ;;  %v1510_v62 = vmul.f32 1.442695, %v1387_v28  ;;  %v1357_v0 = vadd.f32 %v3059_v63, %v1292_v16  ;;  %v1195_v1 = vsub.f32 %v1067_v52, %v1131_v54  ;;  %v1101_v2 = vmul.f32 2.0, %v757_v41 }
 0x16b   : > { %v2504_v36 = vpop.eup %2503  ;;  %1577 = vst [vmem:[%s2789_s12 + $0x1c8] sm:$0xff] %v2502_v61  ;;  %2507 = vpow2.f32 %v1508_v57  ;;  %v1448_v3 = vmul.f32 1.442695, %v1356_v58  ;;  %v1258_v4 = vmax.f32 %v1194_v60, 0.0  ;;  %v1164_v23 = vsub.f32 %v1036_v27, %v1100_v50 }
 0x16c   : > { %v2506_v5 = vpop.eup %2505  ;;  %1546 = vst [vmem:[%s2789_s12 + $0xd0] sm:$0xff] %v2504_v36  ;;  %2509 = vpow2.f32 %v1510_v62  ;;  %v1450_v7 = vmul.f32 1.442695, %v1357_v0  ;;  %v1259_v8 = vmax.f32 %v1195_v1, 0.0  ;;  %v1165_v9 = vsub.f32 %v1037_v34, %v1101_v2 }
 0x16d   : > { %1547 = vst [vmem:[%s2789_s12 + $0xd8] sm:$0xff] %v2506_v5  ;;  %2511 = vpow2.f32 %v1448_v3  ;;  %v1323_v53 = vmul.f32 %v3055_v59, %v1258_v4  ;;  %v1228_v10 = vmax.f32 %v1164_v23, 0.0 }
 0x16e   : > { %2513 = vpow2.f32 %v1450_v7  ;;  %v1324_v11 = vmul.f32 %v3055_v59, %v1259_v8  ;;  %v1229_v37 = vmax.f32 %v1165_v9, 0.0  ;;  %v692_v12 = vpop.f32.mrf.mxu2 }
 0x16f   : > { %v1388_v13 = vadd.f32 %v3059_v63, %v1323_v53  ;;  %v1293_v14 = vmul.f32 %v3055_v59, %v1228_v10  ;;  %v1132_v32 = vmul.f32 2.0, %v692_v12  ;;  %v805_v15 = vpop.f32.mrf.mxu3 }
 0x170   : > { %v1389_v18 = vadd.f32 %v3059_v63, %v1324_v11  ;;  %v1294_v19 = vmul.f32 %v3055_v59, %v1229_v37  ;;  %v1133_v20 = vmul.f32 2.0, %v805_v15 }
 0x171   : > { %v2508_v21 = vpop.eup %2507  ;;  %v1512_v22 = vmul.f32 1.442695, %v1388_v13  ;;  %v1358_v24 = vadd.f32 %v3059_v63, %v1293_v14  ;;  %v1196_v47 = vsub.f32 %v1068_v42, %v1132_v32 }
 0x172   : > { %v2510_v25 = vpop.eup %2509  ;;  %1578 = vst [vmem:[%s2789_s12 + $0x1d0] sm:$0xff] %v2508_v21  ;;  %v1514_v26 = vmul.f32 1.442695, %v1389_v18  ;;  %v1359_v29 = vadd.f32 %v3059_v63, %v1294_v19  ;;  %v1197_v33 = vsub.f32 %v1069_v17, %v1133_v20 }
 0x173   : > { %v2512_v30 = vpop.eup %2511  ;;  %1579 = vst [vmem:[%s2789_s12 + $0x1d8] sm:$0xff] %v2510_v25  ;;  %2515 = vpow2.f32 %v1512_v22  ;;  %v1452_v48 = vmul.f32 1.442695, %v1358_v24  ;;  %v1260_v46 = vmax.f32 %v1196_v47, 0.0 }
 0x174   : > { %v2514_v27 = vpop.eup %2513  ;;  %1548 = vst [vmem:[%s2789_s12 + $0xe0] sm:$0xff] %v2512_v30  ;;  %2517 = vpow2.f32 %v1514_v26  ;;  %v1454_v31 = vmul.f32 1.442695, %v1359_v29  ;;  %v1261_v38 = vmax.f32 %v1197_v33, 0.0 }
 0x175   : > { %1549 = vst [vmem:[%s2789_s12 + $0xe8] sm:$0xff] %v2514_v27  ;;  %2519 = vpow2.f32 %v1452_v48  ;;  %v1325_v34 = vmul.f32 %v3055_v59, %v1260_v46 }
 0x176   : > { %2521 = vpow2.f32 %v1454_v31  ;;  %v1326_v35 = vmul.f32 %v3055_v59, %v1261_v38 }
 0x177   : > { %v1390_v39 = vadd.f32 %v3059_v63, %v1325_v34 }
 0x178   : > { %v1391_v40 = vadd.f32 %v3059_v63, %v1326_v35 }
 0x179   : > { %v2516_v43 = vpop.eup %2515  ;;  %v1516_v44 = vmul.f32 1.442695, %v1390_v39 }
 0x17a   : > { %v2518_v45 = vpop.eup %2517  ;;  %1580 = vst [vmem:[%s2789_s12 + $0x1e0] sm:$0xff] %v2516_v43  ;;  %v1518_v49 = vmul.f32 1.442695, %v1391_v40 }
 0x17b   : > { %v2520_v51 = vpop.eup %2519  ;;  %1581 = vst [vmem:[%s2789_s12 + $0x1e8] sm:$0xff] %v2518_v45  ;;  %2523 = vpow2.f32 %v1516_v44 }
 0x17c   : > { %v2522_v52 = vpop.eup %2521  ;;  %1550 = vst [vmem:[%s2789_s12 + $0xf0] sm:$0xff] %v2520_v51  ;;  %2525 = vpow2.f32 %v1518_v49 }
 0x17d   : > { %1551 = vst [vmem:[%s2789_s12 + $0xf8] sm:$0xff] %v2522_v52 }
 0x181   : > { %v2524_v28 = vpop.eup %2523 }
 0x182   : > { %v2526_v59 = vpop.eup %2525  ;;  %1582 = vst [vmem:[%s2789_s12 + $0x1f0] sm:$0xff] %v2524_v28 }
 0x183   : > { %1583 = vst [vmem:[%s2789_s12 + $0x1f8] sm:$0xff] %v2526_v59 }
 0x184 PF: > { %p2267_p6 = scmp.ne.s32.totalorder %s2624_s21, %s2628_s22 }
 0x186   : > { %1587 = sbr.rel (%p2267_p6) target bundleno = 436 (0x1b4), region = 52 }
 0x18b   : > { %v1588_v63 = vlaneseq  ;;  %v3351_v55 = vstv %s2787_s6  ;;  %v1624_v56 = vld [vmem:[%s2789_s12] sm:$0xff]  ;;  %v1626_v58 = vld [vmem:[%s2789_s12 + $0x10] sm:$0xff] }
 0x18c   : > { %v1628_v61 = vld [vmem:[%s2789_s12 + $0x20] sm:$0xff]  ;;  %v1630_v62 = vld [vmem:[%s2789_s12 + $0x30] sm:$0xff] }
 0x18d   : > { %v3346_v16 = vshrl.u32 %v1588_v63, 7  ;;  %v3348_v54 = vand.u32 127, %v1588_v63  ;;  %v1632_v3 = vld [vmem:[%s2789_s12 + $0x40] sm:$0xff]  ;;  %v1634_v53 = vld [vmem:[%s2789_s12 + $0x50] sm:$0xff] }
 0x18e   : > { %v1636_v10 = vld [vmem:[%s2789_s12 + $0x60] sm:$0xff]  ;;  %v1638_v13 = vld [vmem:[%s2789_s12 + $0x70] sm:$0xff] }
 0x18f   : > { %vm1688_vm1 = vcmp.eq.s32.totalorder %v3346_v16, %v3348_v54  ;;  %v1590_v57 = vadd.s32 8, %v3346_v16  ;;  %v1591_v60 = vadd.s32 16, %v3346_v16  ;;  %v1592_v50 = vadd.s32 24, %v3346_v16  ;;  %v1640_v18 = vld [vmem:[%s2789_s12 + $0x80] sm:$0xff]  ;;  %v1642_v19 = vld [vmem:[%s2789_s12 + $0x90] sm:$0xff] }
 0x190   : > { %v1753_v41 = vsel %vm1688_vm1, %v3351_v55, 0.0  ;;  %v1593_v0 = vadd.s32 32, %v3346_v16  ;;  %v1594_v1 = vadd.s32 40, %v3346_v16  ;;  %v1595_v2 = vadd.s32 48, %v3346_v16  ;;  %v1644_v22 = vld [vmem:[%s2789_s12 + $0xa0] sm:$0xff]  ;;  %v1646_v29 = vld [vmem:[%s2789_s12 + $0xb0] sm:$0xff] }
 0x191   : > { %v1817_v36 = vadd.f32 %v1753_v41, %v1624_v56  ;;  %vm1690_vm2 = vcmp.eq.s32.totalorder %v1590_v57, %v3348_v54  ;;  %vm1692_vm3 = vcmp.eq.s32.totalorder %v1591_v60, %v3348_v54  ;;  %vm1694_vm4 = vcmp.eq.s32.totalorder %v1592_v50, %v3348_v54  ;;  %v1648_v35 = vld [vmem:[%s2789_s12 + $0xc0] sm:$0xff]  ;;  %v1650_v39 = vld [vmem:[%s2789_s12 + $0xd0] sm:$0xff]  ;;  %v1657_v60 = vld [vmem:[%s2789_s12 + $0x108] sm:$0xff] }
 0x192   : > { %v1755_v4 = vsel %vm1690_vm2, %v3351_v55, 0.0  ;;  %v1757_v23 = vsel %vm1692_vm3, %v3351_v55, 0.0  ;;  %v1759_v5 = vsel %vm1694_vm4, %v3351_v55, 0.0  ;;  %vm1696_vm5 = vcmp.eq.s32.totalorder %v1593_v0, %v3348_v54  ;;  %v1652_v45 = vld [vmem:[%s2789_s12 + $0xe0] sm:$0xff]  ;;  %v1654_v49 = vld [vmem:[%s2789_s12 + $0xf0] sm:$0xff]  ;;  %v1659_v50 = vld [vmem:[%s2789_s12 + $0x118] sm:$0xff] }
 0x193   : > { %1881 = vst [vmem:[%s2789_s12] sm:$0xff] %v1817_v36  ;;  %v1819_v6 = vadd.f32 %v1755_v4, %v1626_v58  ;;  %v1821_v7 = vadd.f32 %v1757_v23, %v1628_v61  ;;  %v1823_v8 = vadd.f32 %v1759_v5, %v1630_v62  ;;  %v1761_v9 = vsel %vm1696_vm5, %v3351_v55, 0.0  ;;  %v1663_v4 = vld [vmem:[%s2789_s12 + $0x138] sm:$0xff] }
 0x194   : > { %v1825_v11 = vadd.f32 %v1761_v9, %v1632_v3  ;;  %vm1698_vm6 = vcmp.eq.s32.totalorder %v1594_v1, %v3348_v54  ;;  %vm1700_vm7 = vcmp.eq.s32.totalorder %v1595_v2, %v3348_v54  ;;  %v1596_v37 = vadd.s32 56, %v3346_v16  ;;  %v1661_v3 = vld [vmem:[%s2789_s12 + $0x128] sm:$0xff] }
 0x195   : > { %1883 = vst [vmem:[%s2789_s12 + $0x10] sm:$0xff] %v1819_v6  ;;  %v1763_v12 = vsel %vm1698_vm6, %v3351_v55, 0.0  ;;  %v1765_v42 = vsel %vm1700_vm7, %v3351_v55, 0.0  ;;  %v1597_v14 = vadd.s32 64, %v3346_v16  ;;  %v1598_v32 = vadd.s32 72, %v3346_v16  ;;  %v1665_v6 = vld [vmem:[%s2789_s12 + $0x148] sm:$0xff] }
 0x196   : > { %1885 = vst [vmem:[%s2789_s12 + $0x20] sm:$0xff] %v1821_v7  ;;  %v1827_v15 = vadd.f32 %v1763_v12, %v1634_v53  ;;  %v1829_v17 = vadd.f32 %v1765_v42, %v1636_v10  ;;  %vm1702_vm8 = vcmp.eq.s32.totalorder %v1596_v37, %v3348_v54  ;;  %v1599_v20 = vadd.s32 80, %v3346_v16  ;;  %v1667_v7 = vld [vmem:[%s2789_s12 + $0x158] sm:$0xff] }
 0x197   : > { %1887 = vst [vmem:[%s2789_s12 + $0x30] sm:$0xff] %v1823_v8  ;;  %v1767_v21 = vsel %vm1702_vm8, %v3351_v55, 0.0  ;;  %vm1704_vm9 = vcmp.eq.s32.totalorder %v1597_v14, %v3348_v54  ;;  %vm1706_vm10 = vcmp.eq.s32.totalorder %v1598_v32, %v3348_v54  ;;  %v1600_v24 = vadd.s32 88, %v3346_v16  ;;  %v1671_v14 = vld [vmem:[%s2789_s12 + $0x178] sm:$0xff] }
 0x198   : > { %1889 = vst [vmem:[%s2789_s12 + $0x40] sm:$0xff] %v1825_v11  ;;  %v1831_v47 = vadd.f32 %v1767_v21, %v1638_v13  ;;  %v1769_v25 = vsel %vm1704_vm9, %v3351_v55, 0.0  ;;  %v1771_v26 = vsel %vm1706_vm10, %v3351_v55, 0.0  ;;  %vm1708_vm11 = vcmp.eq.s32.totalorder %v1599_v20, %v3348_v54  ;;  %v1669_v13 = vld [vmem:[%s2789_s12 + $0x168] sm:$0xff] }
 0x199   : > { %1891 = vst [vmem:[%s2789_s12 + $0x50] sm:$0xff] %v1827_v15  ;;  %v1833_v33 = vadd.f32 %v1769_v25, %v1640_v18  ;;  %v1835_v30 = vadd.f32 %v1771_v26, %v1642_v19  ;;  %v1773_v48 = vsel %vm1708_vm11, %v3351_v55, 0.0  ;;  %vm1710_vm12 = vcmp.eq.s32.totalorder %v1600_v24, %v3348_v54  ;;  %v1673_v24 = vld [vmem:[%s2789_s12 + $0x188] sm:$0xff] }
 0x19a   : > { %1893 = vst [vmem:[%s2789_s12 + $0x60] sm:$0xff] %v1829_v17  ;;  %v1837_v46 = vadd.f32 %v1773_v48, %v1644_v22  ;;  %v1775_v27 = vsel %vm1710_vm12, %v3351_v55, 0.0  ;;  %v1601_v31 = vadd.s32 96, %v3346_v16  ;;  %v1602_v38 = vadd.s32 104, %v3346_v16 }
 0x19b   : > { %1895 = vst [vmem:[%s2789_s12 + $0x70] sm:$0xff] %v1831_v47  ;;  %v1839_v34 = vadd.f32 %v1775_v27, %v1646_v29  ;;  %v1603_v40 = vadd.s32 112, %v3346_v16  ;;  %v1604_v43 = vadd.s32 120, %v3346_v16  ;;  %v1605_v44 = vadd.s32 128, %v3346_v16  ;;  %v1675_v47 = vld [vmem:[%s2789_s12 + $0x198] sm:$0xff]  ;;  %v1677_v29 = vld [vmem:[%s2789_s12 + $0x1a8] sm:$0xff] }
 0x19c   : > { %1897 = vst [vmem:[%s2789_s12 + $0x80] sm:$0xff] %v1833_v33  ;;  %vm1712_vm13 = vcmp.eq.s32.totalorder %v1601_v31, %v3348_v54  ;;  %vm1714_vm14 = vcmp.eq.s32.totalorder %v1602_v38, %v3348_v54  ;;  %v3422_v51 = vadd.s32 128, %v3348_v54  ;;  %v1606_v52 = vadd.s32 136, %v3346_v16  ;;  %v1679_v33 = vld [vmem:[%s2789_s12 + $0x1b8] sm:$0xff] }
 0x19d   : > { %1899 = vst [vmem:[%s2789_s12 + $0x90] sm:$0xff] %v1835_v30  ;;  %v1777_v28 = vsel %vm1712_vm13, %v3351_v55, 0.0  ;;  %v1779_v59 = vsel %vm1714_vm14, %v3351_v55, 0.0  ;;  %vm1716_vm15 = vcmp.eq.s32.totalorder %v1603_v40, %v3348_v54  ;;  %vm1718_vm0 = vcmp.eq.s32.totalorder %v1604_v43, %v3348_v54  ;;  %v1683_v40 = vld [vmem:[%s2789_s12 + $0x1d8] sm:$0xff] }
 0x19e   : > { %1901 = vst [vmem:[%s2789_s12 + $0xa0] sm:$0xff] %v1837_v46  ;;  %v1841_v63 = vadd.f32 %v1777_v28, %v1648_v35  ;;  %v1843_v56 = vadd.f32 %v1779_v59, %v1650_v39  ;;  %v1781_v57 = vsel %vm1716_vm15, %v3351_v55, 0.0  ;;  %v1783_v58 = vsel %vm1718_vm0, %v3351_v55, 0.0  ;;  %v1681_v39 = vld [vmem:[%s2789_s12 + $0x1c8] sm:$0xff] }
 0x19f   : > { %1903 = vst [vmem:[%s2789_s12 + $0xb0] sm:$0xff] %v1839_v34  ;;  %v1845_v41 = vadd.f32 %v1781_v57, %v1652_v45  ;;  %v1847_v61 = vadd.f32 %v1783_v58, %v1654_v49  ;;  %vm1721_vm1 = vcmp.eq.s32.totalorder %v1605_v44, %v3422_v51  ;;  %vm1723_vm2 = vcmp.eq.s32.totalorder %v1606_v52, %v3422_v51  ;;  %v1687_v57 = vld [vmem:[%s2789_s12 + $0x1f8] sm:$0xff] }
 0x1a0   : > { %1905 = vst [vmem:[%s2789_s12 + $0xc0] sm:$0xff] %v1841_v63  ;;  %v1786_v54 = vsel %vm1721_vm1, %v3351_v55, 0.0  ;;  %v1788_v62 = vsel %vm1723_vm2, %v3351_v55, 0.0  ;;  %v1607_v0 = vadd.s32 144, %v3346_v16  ;;  %v1608_v1 = vadd.s32 152, %v3346_v16 }
 0x1a1   : > { %1907 = vst [vmem:[%s2789_s12 + $0xd0] sm:$0xff] %v1843_v56  ;;  %v1850_v2 = vadd.f32 %v1786_v54, %v1657_v60  ;;  %v1852_v36 = vadd.f32 %v1788_v62, %v1659_v50  ;;  %v1609_v23 = vadd.s32 160, %v3346_v16  ;;  %v1610_v5 = vadd.s32 168, %v3346_v16  ;;  %v1685_v56 = vld [vmem:[%s2789_s12 + $0x1e8] sm:$0xff] }
 0x1a2   : > { %1909 = vst [vmem:[%s2789_s12 + $0xe0] sm:$0xff] %v1845_v41  ;;  %vm1725_vm3 = vcmp.eq.s32.totalorder %v1607_v0, %v3422_v51  ;;  %vm1727_vm4 = vcmp.eq.s32.totalorder %v1608_v1, %v3422_v51  ;;  %v1611_v8 = vadd.s32 176, %v3346_v16  ;;  %v1612_v9 = vadd.s32 184, %v3346_v16 }
 0x1a3   : > { %1911 = vst [vmem:[%s2789_s12 + $0xf0] sm:$0xff] %v1847_v61  ;;  %v1790_v53 = vsel %vm1725_vm3, %v3351_v55, 0.0  ;;  %v1792_v10 = vsel %vm1727_vm4, %v3351_v55, 0.0  ;;  %vm1729_vm5 = vcmp.eq.s32.totalorder %v1609_v23, %v3422_v51  ;;  %vm1731_vm6 = vcmp.eq.s32.totalorder %v1610_v5, %v3422_v51 }
 0x1a4   : > { %1914 = vst [vmem:[%s2789_s12 + $0x108] sm:$0xff] %v1850_v2  ;;  %v1854_v11 = vadd.f32 %v1790_v53, %v1661_v3  ;;  %v1856_v37 = vadd.f32 %v1792_v10, %v1663_v4  ;;  %v1794_v12 = vsel %vm1729_vm5, %v3351_v55, 0.0  ;;  %v1796_v42 = vsel %vm1731_vm6, %v3351_v55, 0.0 }
 0x1a5   : > { %1916 = vst [vmem:[%s2789_s12 + $0x118] sm:$0xff] %v1852_v36  ;;  %v1858_v32 = vadd.f32 %v1794_v12, %v1665_v6  ;;  %v1860_v15 = vadd.f32 %v1796_v42, %v1667_v7  ;;  %vm1733_vm7 = vcmp.eq.s32.totalorder %v1611_v8, %v3422_v51  ;;  %vm1735_vm8 = vcmp.eq.s32.totalorder %v1612_v9, %v3422_v51 }
 0x1a6   : > { %1918 = vst [vmem:[%s2789_s12 + $0x128] sm:$0xff] %v1854_v11  ;;  %v1798_v17 = vsel %vm1733_vm7, %v3351_v55, 0.0  ;;  %v1800_v18 = vsel %vm1735_vm8, %v3351_v55, 0.0  ;;  %v1613_v19 = vadd.s32 192, %v3346_v16  ;;  %v1614_v20 = vadd.s32 200, %v3346_v16 }
 0x1a7   : > { %1920 = vst [vmem:[%s2789_s12 + $0x138] sm:$0xff] %v1856_v37  ;;  %v1862_v21 = vadd.f32 %v1798_v17, %v1669_v13  ;;  %v1864_v22 = vadd.f32 %v1800_v18, %v1671_v14  ;;  %v1615_v25 = vadd.s32 208, %v3346_v16  ;;  %v1616_v26 = vadd.s32 216, %v3346_v16 }
 0x1a8   : > { %1922 = vst [vmem:[%s2789_s12 + $0x148] sm:$0xff] %v1858_v32  ;;  %vm1737_vm9 = vcmp.eq.s32.totalorder %v1613_v19, %v3422_v51  ;;  %vm1739_vm10 = vcmp.eq.s32.totalorder %v1614_v20, %v3422_v51  ;;  %v1617_v30 = vadd.s32 224, %v3346_v16  ;;  %v1618_v48 = vadd.s32 232, %v3346_v16 }
 0x1a9   : > { %1924 = vst [vmem:[%s2789_s12 + $0x158] sm:$0xff] %v1860_v15  ;;  %v1802_v46 = vsel %vm1737_vm9, %v3351_v55, 0.0  ;;  %v1804_v27 = vsel %vm1739_vm10, %v3351_v55, 0.0  ;;  %vm1741_vm11 = vcmp.eq.s32.totalorder %v1615_v25, %v3422_v51  ;;  %vm1743_vm12 = vcmp.eq.s32.totalorder %v1616_v26, %v3422_v51 }
 0x1aa   : > { %1926 = vst [vmem:[%s2789_s12 + $0x168] sm:$0xff] %v1862_v21  ;;  %v1866_v31 = vadd.f32 %v1802_v46, %v1673_v24  ;;  %v1868_v38 = vadd.f32 %v1804_v27, %v1675_v47  ;;  %v1806_v34 = vsel %vm1741_vm11, %v3351_v55, 0.0  ;;  %v1808_v35 = vsel %vm1743_vm12, %v3351_v55, 0.0 }
 0x1ab   : > { %1928 = vst [vmem:[%s2789_s12 + $0x178] sm:$0xff] %v1864_v22  ;;  %v1870_v43 = vadd.f32 %v1806_v34, %v1677_v29  ;;  %v1872_v44 = vadd.f32 %v1808_v35, %v1679_v33  ;;  %vm1745_vm13 = vcmp.eq.s32.totalorder %v1617_v30, %v3422_v51  ;;  %vm1747_vm14 = vcmp.eq.s32.totalorder %v1618_v48, %v3422_v51 }
 0x1ac   : > { %1930 = vst [vmem:[%s2789_s12 + $0x188] sm:$0xff] %v1866_v31  ;;  %v1810_v45 = vsel %vm1745_vm13, %v3351_v55, 0.0  ;;  %v1812_v49 = vsel %vm1747_vm14, %v3351_v55, 0.0  ;;  %v1619_v52 = vadd.s32 240, %v3346_v16  ;;  %v1620_v28 = vadd.s32 248, %v3346_v16 }
 0x1ad   : > { %1932 = vst [vmem:[%s2789_s12 + $0x198] sm:$0xff] %v1868_v38  ;;  %v1874_v59 = vadd.f32 %v1810_v45, %v1681_v39  ;;  %v1876_v63 = vadd.f32 %v1812_v49, %v1683_v40 }
 0x1ae   : > { %1934 = vst [vmem:[%s2789_s12 + $0x1a8] sm:$0xff] %v1870_v43  ;;  %vm1749_vm15 = vcmp.eq.s32.totalorder %v1619_v52, %v3422_v51  ;;  %vm1751_vm0 = vcmp.eq.s32.totalorder %v1620_v28, %v3422_v51 }
 0x1af   : > { %1936 = vst [vmem:[%s2789_s12 + $0x1b8] sm:$0xff] %v1872_v44  ;;  %v1814_v58 = vsel %vm1749_vm15, %v3351_v55, 0.0  ;;  %v1816_v60 = vsel %vm1751_vm0, %v3351_v55, 0.0 }
 0x1b0   : > { %1938 = vst [vmem:[%s2789_s12 + $0x1c8] sm:$0xff] %v1874_v59  ;;  %v1878_v50 = vadd.f32 %v1814_v58, %v1685_v56  ;;  %v1880_v16 = vadd.f32 %v1816_v60, %v1687_v57 }
 0x1b1   : > { %1940 = vst [vmem:[%s2789_s12 + $0x1d8] sm:$0xff] %v1876_v63 }
 0x1b2   : > { %1942 = vst [vmem:[%s2789_s12 + $0x1e8] sm:$0xff] %v1878_v50 }
 0x1b3   : > { %1944 = vst [vmem:[%s2789_s12 + $0x1f8] sm:$0xff] %v1880_v16 }
 0x1b4 PF: > { %p2268_p7 = scmp.le.s32.totalorder %s2624_s21, %s2628_s22 }
 0x1b6   : > { %1948 = sbr.rel (%p2268_p7) target bundleno = 508 (0x1fc), region = 56 }
 0x1bb   : > { %v2644_v41 = vmov 0.0  }
 0x1bc   : > { %1949 = vst [vmem:[%s2789_s12] sm:$0xff] %v2644_v41 }
 0x1bd   : > { %1950 = vst [vmem:[%s2789_s12 + $0x8] sm:$0xff] %v2644_v41 }
 0x1be   : > { %1951 = vst [vmem:[%s2789_s12 + $0x10] sm:$0xff] %v2644_v41 }
 0x1bf   : > { %1952 = vst [vmem:[%s2789_s12 + $0x18] sm:$0xff] %v2644_v41 }
 0x1c0   : > { %1953 = vst [vmem:[%s2789_s12 + $0x20] sm:$0xff] %v2644_v41 }
 0x1c1   : > { %1954 = vst [vmem:[%s2789_s12 + $0x28] sm:$0xff] %v2644_v41 }
 0x1c2   : > { %1955 = vst [vmem:[%s2789_s12 + $0x30] sm:$0xff] %v2644_v41 }
 0x1c3   : > { %1956 = vst [vmem:[%s2789_s12 + $0x38] sm:$0xff] %v2644_v41 }
 0x1c4   : > { %1957 = vst [vmem:[%s2789_s12 + $0x40] sm:$0xff] %v2644_v41 }
 0x1c5   : > { %1958 = vst [vmem:[%s2789_s12 + $0x48] sm:$0xff] %v2644_v41 }
 0x1c6   : > { %1959 = vst [vmem:[%s2789_s12 + $0x50] sm:$0xff] %v2644_v41 }
 0x1c7   : > { %1960 = vst [vmem:[%s2789_s12 + $0x58] sm:$0xff] %v2644_v41 }
 0x1c8   : > { %1961 = vst [vmem:[%s2789_s12 + $0x60] sm:$0xff] %v2644_v41 }
 0x1c9   : > { %1962 = vst [vmem:[%s2789_s12 + $0x68] sm:$0xff] %v2644_v41 }
 0x1ca   : > { %1963 = vst [vmem:[%s2789_s12 + $0x70] sm:$0xff] %v2644_v41 }
 0x1cb   : > { %1964 = vst [vmem:[%s2789_s12 + $0x78] sm:$0xff] %v2644_v41 }
 0x1cc   : > { %1965 = vst [vmem:[%s2789_s12 + $0x80] sm:$0xff] %v2644_v41 }
 0x1cd   : > { %1966 = vst [vmem:[%s2789_s12 + $0x88] sm:$0xff] %v2644_v41 }
 0x1ce   : > { %1967 = vst [vmem:[%s2789_s12 + $0x90] sm:$0xff] %v2644_v41 }
 0x1cf   : > { %1968 = vst [vmem:[%s2789_s12 + $0x98] sm:$0xff] %v2644_v41 }
 0x1d0   : > { %1969 = vst [vmem:[%s2789_s12 + $0xa0] sm:$0xff] %v2644_v41 }
 0x1d1   : > { %1970 = vst [vmem:[%s2789_s12 + $0xa8] sm:$0xff] %v2644_v41 }
 0x1d2   : > { %1971 = vst [vmem:[%s2789_s12 + $0xb0] sm:$0xff] %v2644_v41 }
 0x1d3   : > { %1972 = vst [vmem:[%s2789_s12 + $0xb8] sm:$0xff] %v2644_v41 }
 0x1d4   : > { %1973 = vst [vmem:[%s2789_s12 + $0xc0] sm:$0xff] %v2644_v41 }
 0x1d5   : > { %1974 = vst [vmem:[%s2789_s12 + $0xc8] sm:$0xff] %v2644_v41 }
 0x1d6   : > { %1975 = vst [vmem:[%s2789_s12 + $0xd0] sm:$0xff] %v2644_v41 }
 0x1d7   : > { %1976 = vst [vmem:[%s2789_s12 + $0xd8] sm:$0xff] %v2644_v41 }
 0x1d8   : > { %1977 = vst [vmem:[%s2789_s12 + $0xe0] sm:$0xff] %v2644_v41 }
 0x1d9   : > { %1978 = vst [vmem:[%s2789_s12 + $0xe8] sm:$0xff] %v2644_v41 }
 0x1da   : > { %1979 = vst [vmem:[%s2789_s12 + $0xf0] sm:$0xff] %v2644_v41 }
 0x1db   : > { %1980 = vst [vmem:[%s2789_s12 + $0xf8] sm:$0xff] %v2644_v41 }
 0x1dc   : > { %1981 = vst [vmem:[%s2789_s12 + $0x100] sm:$0xff] %v2644_v41 }
 0x1dd   : > { %1982 = vst [vmem:[%s2789_s12 + $0x108] sm:$0xff] %v2644_v41 }
 0x1de   : > { %1983 = vst [vmem:[%s2789_s12 + $0x110] sm:$0xff] %v2644_v41 }
 0x1df   : > { %1984 = vst [vmem:[%s2789_s12 + $0x118] sm:$0xff] %v2644_v41 }
 0x1e0   : > { %1985 = vst [vmem:[%s2789_s12 + $0x120] sm:$0xff] %v2644_v41 }
 0x1e1   : > { %1986 = vst [vmem:[%s2789_s12 + $0x128] sm:$0xff] %v2644_v41 }
 0x1e2   : > { %1987 = vst [vmem:[%s2789_s12 + $0x130] sm:$0xff] %v2644_v41 }
 0x1e3   : > { %1988 = vst [vmem:[%s2789_s12 + $0x138] sm:$0xff] %v2644_v41 }
 0x1e4   : > { %1989 = vst [vmem:[%s2789_s12 + $0x140] sm:$0xff] %v2644_v41 }
 0x1e5   : > { %1990 = vst [vmem:[%s2789_s12 + $0x148] sm:$0xff] %v2644_v41 }
 0x1e6   : > { %1991 = vst [vmem:[%s2789_s12 + $0x150] sm:$0xff] %v2644_v41 }
 0x1e7   : > { %1992 = vst [vmem:[%s2789_s12 + $0x158] sm:$0xff] %v2644_v41 }
 0x1e8   : > { %1993 = vst [vmem:[%s2789_s12 + $0x160] sm:$0xff] %v2644_v41 }
 0x1e9   : > { %1994 = vst [vmem:[%s2789_s12 + $0x168] sm:$0xff] %v2644_v41 }
 0x1ea   : > { %1995 = vst [vmem:[%s2789_s12 + $0x170] sm:$0xff] %v2644_v41 }
 0x1eb   : > { %1996 = vst [vmem:[%s2789_s12 + $0x178] sm:$0xff] %v2644_v41 }
 0x1ec   : > { %1997 = vst [vmem:[%s2789_s12 + $0x180] sm:$0xff] %v2644_v41 }
 0x1ed   : > { %1998 = vst [vmem:[%s2789_s12 + $0x188] sm:$0xff] %v2644_v41 }
 0x1ee   : > { %1999 = vst [vmem:[%s2789_s12 + $0x190] sm:$0xff] %v2644_v41 }
 0x1ef   : > { %2000 = vst [vmem:[%s2789_s12 + $0x198] sm:$0xff] %v2644_v41 }
 0x1f0   : > { %2001 = vst [vmem:[%s2789_s12 + $0x1a0] sm:$0xff] %v2644_v41 }
 0x1f1   : > { %2002 = vst [vmem:[%s2789_s12 + $0x1a8] sm:$0xff] %v2644_v41 }
 0x1f2   : > { %2003 = vst [vmem:[%s2789_s12 + $0x1b0] sm:$0xff] %v2644_v41 }
 0x1f3   : > { %2004 = vst [vmem:[%s2789_s12 + $0x1b8] sm:$0xff] %v2644_v41 }
 0x1f4   : > { %2005 = vst [vmem:[%s2789_s12 + $0x1c0] sm:$0xff] %v2644_v41 }
 0x1f5   : > { %2006 = vst [vmem:[%s2789_s12 + $0x1c8] sm:$0xff] %v2644_v41 }
 0x1f6   : > { %2007 = vst [vmem:[%s2789_s12 + $0x1d0] sm:$0xff] %v2644_v41 }
 0x1f7   : > { %2008 = vst [vmem:[%s2789_s12 + $0x1d8] sm:$0xff] %v2644_v41 }
 0x1f8   : > { %2009 = vst [vmem:[%s2789_s12 + $0x1e0] sm:$0xff] %v2644_v41 }
 0x1f9   : > { %2010 = vst [vmem:[%s2789_s12 + $0x1e8] sm:$0xff] %v2644_v41 }
 0x1fa   : > { %2011 = vst [vmem:[%s2789_s12 + $0x1f0] sm:$0xff] %v2644_v41 }
 0x1fb   : > { %2012 = vst [vmem:[%s2789_s12 + $0x1f8] sm:$0xff] %v2644_v41 }
 0x1fc PF: > { %s2276_s1 = sshll.u32 %s2628_s22, 7  ;;  %s2029_s23 = sshll.u32 %s2789_s12, 4  ;;  %s2030_s23 = int_to_ptr.vmem [resolvable:$true] %s2029_s23 }
 0x1fd   : > { %s2026_s21 = sadd.s32 %s2276_s1, %s2758_s30  ;;  %s3713_s11 = sand.u32 1, %s2616_s19  }
 0x1fe   : > { %s2273_s28 = sshll.u32 %s2026_s21, 3  ;;  %s2014_s13 = scalar_lea.sflag [#allocation3], %s3713_s11 }
 0x1ff   : > { %s2028_s26 = scalar_lea.hbm %s3697_s5, %s2273_s28  ;;  %s2562_s9 = scalar_lea.hbm %s3697_s5, 2048 }
 0x200   : > { %s2031_s27 = sshll.u32 %s2028_s26, 4  ;;  %s2032_s27 = int_to_ptr.hbm [resolvable:$true] %s2031_s27 }
 0x201   : > { %s2556_s15 = sshra.s32 %s2032_s27, 4  ;;  %s2557_s15 = int_to_ptr.hbm [resolvable:$true] %s2556_s15 }
 0x202   : > { %s2558_s17 = scalar_lea.hbm %s2557_s15, 512  ;;  %p2563_p12 = scmp.lt.s32.totalorder %s2557_s15, %s3697_s5 }
 0x203   : > { %p2559_p9 = scmp.ne.s32.totalorder %s2557_s15, %s2558_s17  ;;  %p2564_p13 = scmp.lt.s32.totalorder %s2562_s9, %s2558_s17 }
 0x205   : > { %p2560_p10 = pnand %p2559_p9, %p2730_p3  ;;  %p2565_p0 = por %p2564_p13, %p2563_p12 }
 0x207   : > { %p2561_p11 = pneg %p2560_p10 }
 0x209   : > { %p2566_p1 = pnand %p2565_p0, %p2561_p11 }
 0x20b   : > { %2569 = shalt.err (!%p2566_p1)
}
 0x20c   : > { %s2645_s12 = smov 256   ;;  %s2646_s0 = smov 512  }
 0x20d   : > { %s2647_s24 = smov 16  }
 0x20e   : > { %2313 = dma.vmem_to_hbm [thread:$0]  (%p2730_p3), %s2030_s23, 8192, %s2032_s27, %s2014_s13, %s2645_s12, %s2646_s0, %s2647_s24  }
 0x20f PF: > { %p2325_p2 = scmp.ge.s32.totalorder %s2640_s25, 2  ;;  %s2046_s1 = sand.u32 1, %s2612_s18  }
 0x210   : > { %s2047_s21 = scalar_lea.sflag [#allocation3], %s2046_s1 }
 0x211   : > { %p2320_p4 = pnand %p2325_p2, %p2739_p8 }
 0x213   : > { %p2321_p5 = pneg %p2320_p4 }
 0x215   : > { %2607 = dma.done.wait (%p2321_p5), %s2047_s21, 8192  }
 0x216   : > { %2609 = vsyncadd (%p2321_p5), %s2047_s21, 4294959104  ;;  %s19_s25 = sadd.s32 1, %s2640_s25   ;;  %s3714_s21 = sld [smem:[#allocation8_spill]] }
 0x217   : > { %p16_p6 = scmp.ge.s32.totalorder %s19_s25, 6   ;;  %s3715_s22 = sld [smem:[#allocation9_spill]] }
 0x218   : > { %s3716_s23 = sld [smem:[#allocation10_spill]]  ;;  %s3718_s18 = smov %s2616_s19 }
 0x219   : > { %s3717_s24 = sld [smem:[#allocation11_spill]]  ;;  %s3719_s19 = smov %s2620_s20 }
 0x21a   : > { %s3720_s20 = smov %s2750_s14  ;;  %18 = sbr.rel (!%p16_p6) target bundleno = 9 (0x9), region = 101 }
 0x21f   :  { %2053 = vsyncpa [#allocation3], 1 }
 0x220   :  { %2055 = vsyncpa [#allocation3 + $0x1], 1 }
 0x221   :  { %2056 = vsyncpa [#allocation4], 1 }
 0x222   :  { %2058 = vsyncpa [#allocation4 + $0x1], 1 }

</bundles_post_ra>
